<compile_context>
chip_gen: v7x
topology: tpu7x:2x2x1
jax: 0.10.0
libtpu: 0.0.40
codegen_flags: <defaults>
</compile_context>

<pallas_src>
import math

import jax
import jax.numpy as jnp
import numpy as np
from jax.experimental import pallas as pl
from jax.experimental.pallas import tpu as pltpu

_GN_EPS = 1e-5
_INV_SQRT2 = 0.7071067811865476


def compute_layer_channels(in_channel, trg_channel, num_layers):
    current_channel = in_channel
    channel_list = [current_channel]
    step = (trg_channel - in_channel) / num_layers
    for _ in range(num_layers):
        current_channel += step
        channel_list.append(int(current_channel))
    return channel_list


def _erf(x):
    # Abramowitz & Stegun 7.1.26 (max abs err ~1.5e-7 -> float32-exact GELU).
    a1, a2, a3, a4, a5 = (0.254829592, -0.284496736, 1.421413741,
                          -1.453152027, 1.061405429)
    p = 0.3275911
    s = jnp.where(x >= 0.0, 1.0, -1.0)
    ax = jnp.abs(x)
    t = 1.0 / (1.0 + p * ax)
    poly = ((((a5 * t + a4) * t + a3) * t + a2) * t + a1) * t
    return s * (1.0 - poly * jnp.exp(-ax * ax))


def _make_decoder_kernel(layer_cfgs, n_params):
    """layer_cfgs: list of (Cin, Cout, K, upsample) static python values."""

    def kernel(*refs):
        x_ref = refs[0]
        p_refs = refs[1:1 + n_params]
        o_ref = refs[1 + n_params]
        xp_refs = refs[2 + n_params:]          # one staging buffer per layer

        x = x_ref[0]                           # (C0, L0) float32
        L = x.shape[1]
        pi = 0
        for li, (Cin, Cout, K, upsample) in enumerate(layer_cfgs):
            gamma = p_refs[pi + 0][...]        # (Cin, 1)
            beta = p_refs[pi + 1][...]         # (Cin, 1)
            w_fused = p_refs[pi + 2][...]      # (Cout, K*Cin)  conv+residual
            b_fused = p_refs[pi + 3][...]      # (Cout, 1)
            up_mat = p_refs[pi + 4][...] if upsample else None   # (L, 2L)
            pi += 5 if upsample else 4
            pad = (K - 1) // 2
            xp_ref = xp_refs[li]               # (Cin, L + 2*pad)

            # GroupNorm(num_groups=Cin): per-channel stats over L, affine
            # folded into one scale/shift.
            mu = jnp.mean(x, axis=1, keepdims=True)
            var = jnp.mean((x - mu) ** 2, axis=1, keepdims=True)
            scale = jax.lax.rsqrt(var + _GN_EPS) * gamma
            shift = beta - mu * scale
            xn = x * scale + shift
            # Exact (erf-based) GELU.
            xg = 0.5 * xn * (1.0 + _erf(xn * _INV_SQRT2))

            # Stage into the zero-padded buffer for a "same" convolution.
            # Only the 2*pad halo lanes are zeroed (never the whole buffer,
            # and NOT a program_id==0-only init, which would be wrong under
            # megacore 'parallel' partitioning).
            xp_ref[:, :pad] = jnp.zeros((Cin, pad), jnp.float32)
            xp_ref[:, pad + L:] = jnp.zeros((Cin, pad), jnp.float32)
            xp_ref[:, pad:pad + L] = xg

            # im2col (K*Cin, L): K shifted windows stacked along sublanes.
            # Conv + residual 1x1 conv + skip add + biases collapse to ONE
            # MXU matmul (weights/biases folded host-side).
            cols = jnp.concatenate(
                [xp_ref[:, k:k + L] for k in range(K)], axis=0)
            y = jnp.dot(w_fused, cols,
                        preferred_element_type=jnp.float32) + b_fused

            if upsample:
                # nn.Upsample(scale_factor=2, mode='nearest') as one matmul
                # with a precomputed constant 0/1 interleave matrix: the MXU
                # does the data movement, output stays lane-dense.
                y = jnp.dot(y, up_mat, preferred_element_type=jnp.float32)
                L = 2 * L
            x = y

        o_ref[0] = x.astype(o_ref.dtype)

    return kernel


def img2seq_decoder_pallas(x, blocks):
    """x: (B, C0, L0) float32; blocks: list of dicts from init_img2seq_decoder."""
    B, C0, L0 = x.shape

    layer_cfgs = []
    flat_params = []
    in_specs = [pl.BlockSpec((1, C0, L0), lambda bb: (bb, 0, 0))]
    scratch_shapes = []

    L = L0
    for blk in blocks:
        gamma, beta, w_eq, b, wr, br = blk["params"]
        K, Cout, Cin = w_eq.shape
        assert K == blk["kernel_size"]
        # (Cout, K*Cin) conv slab: w_slab[o, k*Cin + c] == w_eq[k, o, c].
        w_slab = jnp.transpose(w_eq, (1, 0, 2)).reshape(Cout, K * Cin)
        # Fold residual 1x1 conv + skip add + biases into the slab:
        #   y = acc + (wr@acc + br) = (I+wr)@(w_slab@cols + b) + br
        m = jnp.eye(Cout, dtype=jnp.float32) + wr
        w_fused = m @ w_slab
        b_fused = m @ b + br
        upsample = bool(blk["upsample"])
        layer_cfgs.append((Cin, Cout, K, upsample))

        params_this = [gamma, beta, w_fused, b_fused]
        if upsample:
            # Constant 0/1 interleave matrix (L, 2L): columns 2j and 2j+1
            # both select row j  ->  y @ up == nearest x2 upsample.
            rows = np.arange(L)[:, None]
            cols_ = np.arange(2 * L)[None, :]
            params_this.append(jnp.asarray((cols_ // 2 == rows),
                                           dtype=jnp.float32))
        for arr in params_this:
            flat_params.append(arr)
            in_specs.append(pl.BlockSpec(arr.shape, lambda bb: (0, 0)))
        scratch_shapes.append(pltpu.VMEM((Cin, L + K - 1), jnp.float32))
        if upsample:
            L *= 2
    Lf = L
    Cf = layer_cfgs[-1][1]
    n_params = len(flat_params)

    return pl.pallas_call(
        _make_decoder_kernel(layer_cfgs, n_params),
        out_shape=jax.ShapeDtypeStruct((B, Cf, Lf), jnp.float32),
        grid_spec=pltpu.PrefetchScalarGridSpec(
            num_scalar_prefetch=0,
            grid=(B,),
            in_specs=in_specs,
            out_specs=pl.BlockSpec((1, Cf, Lf), lambda bb: (bb, 0, 0)),
            scratch_shapes=scratch_shapes,
        ),
        compiler_params=pltpu.CompilerParams(
            dimension_semantics=("parallel",)),
    )(x, *flat_params)


def init_conv_block_params(key, in_channel, out_channel, kernel_size, transpose):
    k_g, k_b, k_w, k_wb, k_rw, k_rb = jax.random.split(key, 6)
    gamma = (1.0 + 0.1 * jax.random.normal(k_g, (in_channel, 1)))
    beta = 0.1 * jax.random.normal(k_b, (in_channel, 1))
    scale = 1.0 / math.sqrt(in_channel * kernel_size)
    if transpose:
        # PyTorch ConvTranspose1d weight layout: (in, out, K).
        w_t = scale * jax.random.normal(k_w, (in_channel, out_channel, kernel_size))
        # stride-1 ConvTranspose1d(pad=(K-1)//2) == "same" cross-correlation
        # with channel-swapped, kernel-flipped weights:
        #   w_eq[k, o, i] = w_t[i, o, K-1-k]
        w_eq = jnp.flip(w_t, axis=2).transpose(2, 1, 0)
    else:
        # PyTorch Conv1d weight layout: (out, in, K).
        w_c = scale * jax.random.normal(k_w, (out_channel, in_channel, kernel_size))
        w_eq = w_c.transpose(2, 0, 1)
    b = scale * jax.random.normal(k_wb, (out_channel, 1))
    wr = (1.0 / math.sqrt(out_channel)) * jax.random.normal(k_rw, (out_channel, out_channel))
    br = (1.0 / math.sqrt(out_channel)) * jax.random.normal(k_rb, (out_channel, 1))
    return tuple(t.astype(jnp.float32) for t in (gamma, beta, w_eq, b, wr, br))


def init_img2seq_decoder(key, in_channel, target_channel, num_layers):
    channel_list = compute_layer_channels(target_channel // 2, target_channel,
                                          num_layers)
    channel_list.reverse()
    keys = jax.random.split(key, num_layers + 1)
    blocks = []
    for idx, (i, j) in enumerate(zip(channel_list[:-1], channel_list[1:])):
        blocks.append(dict(params=init_conv_block_params(keys[idx], i, j, 3, True),
                           kernel_size=3, upsample=True))
    blocks.append(dict(params=init_conv_block_params(keys[-1], channel_list[-1],
                                                     in_channel, 9, False),
                       kernel_size=9, upsample=False))
    return blocks


# ---------------- pure-JAX reference (correctness check; unfused) --------
def conv_block_ref(x, params, kernel_size, upsample):
    gamma, beta, w_eq, b, wr, br = params
    pad = (kernel_size - 1) // 2
    mu = x.mean(axis=-1, keepdims=True)
    var = ((x - mu) ** 2).mean(axis=-1, keepdims=True)
    xn = (x - mu) / jnp.sqrt(var + _GN_EPS) * gamma[None] + beta[None]
    xg = 0.5 * xn * (1.0 + jax.lax.erf(xn * _INV_SQRT2))
    w_oik = jnp.transpose(w_eq, (1, 2, 0))
    y = jax.lax.conv_general_dilated(
        xg, w_oik, window_strides=(1,), padding=[(pad, pad)],
        dimension_numbers=("NCH", "OIH", "NCH")) + b[None]
    out = y + jnp.einsum("oc,bcl->bol", wr, y) + br[None]
    if upsample:
        out = jnp.repeat(out, 2, axis=-1)
    return out


if __name__ == "__main__":
    in_channel, target_channel, num_layers = 5, 32, 2
    B, L = 2, 32

    key = jax.random.PRNGKey(0)
    k_params, k_x = jax.random.split(key)
    blocks = init_img2seq_decoder(k_params, in_channel, target_channel, num_layers)
    x = jax.random.normal(k_x, (B, target_channel, L), dtype=jnp.float32)

    out = img2seq_decoder_pallas(x, blocks)
    out = jax.block_until_ready(out)
    assert out.shape == (B, in_channel, L * (2 ** num_layers)), out.shape

    ref = x
    for blk in blocks:
        ref = conv_block_ref(ref, blk["params"], blk["kernel_size"], blk["upsample"])
    np.testing.assert_allclose(np.asarray(out), np.asarray(ref),
                               rtol=2e-3, atol=2e-3)
    print("KERNEL_OK")
</pallas_src>

<mosaic_0001>
module attributes {stable_mosaic.version = 11 : i64} {
  func.func @kernel(%arg0: i32, %arg1: memref<1x32x32xf32, #tpu.memory_space<vmem>>, %arg2: memref<32x1xf32, #tpu.memory_space<vmem>>, %arg3: memref<32x1xf32, #tpu.memory_space<vmem>>, %arg4: memref<24x96xf32, #tpu.memory_space<vmem>>, %arg5: memref<24x1xf32, #tpu.memory_space<vmem>>, %arg6: memref<32x64xf32, #tpu.memory_space<vmem>>, %arg7: memref<24x1xf32, #tpu.memory_space<vmem>>, %arg8: memref<24x1xf32, #tpu.memory_space<vmem>>, %arg9: memref<16x72xf32, #tpu.memory_space<vmem>>, %arg10: memref<16x1xf32, #tpu.memory_space<vmem>>, %arg11: memref<64x128xf32, #tpu.memory_space<vmem>>, %arg12: memref<16x1xf32, #tpu.memory_space<vmem>>, %arg13: memref<16x1xf32, #tpu.memory_space<vmem>>, %arg14: memref<5x144xf32, #tpu.memory_space<vmem>>, %arg15: memref<5x1xf32, #tpu.memory_space<vmem>>, %arg16: memref<1x5x128xf32, #tpu.memory_space<vmem>>, %arg17: memref<32x34xf32, #tpu.memory_space<vmem>>, %arg18: memref<24x66xf32, #tpu.memory_space<vmem>>, %arg19: memref<16x136xf32, #tpu.memory_space<vmem>>) attributes {dimension_semantics = [#tpu.dimension_semantics<parallel>], iteration_bounds = array<i64: 2>, scalar_prefetch = 0 : i64, scratch_operands = 3 : i64, tpu.core_type = #tpu.core_type<tc>, window_params = [{transform_indices = @transform_0, window_bounds = array<i64: 1, 32, 32>}, {pipeline_mode = #tpu.pipeline_mode<synchronous>, transform_indices = @transform_1, window_bounds = array<i64: 32, 1>}, {pipeline_mode = #tpu.pipeline_mode<synchronous>, transform_indices = @transform_2, window_bounds = array<i64: 32, 1>}, {pipeline_mode = #tpu.pipeline_mode<synchronous>, transform_indices = @transform_3, window_bounds = array<i64: 24, 96>}, {pipeline_mode = #tpu.pipeline_mode<synchronous>, transform_indices = @transform_4, window_bounds = array<i64: 24, 1>}, {pipeline_mode = #tpu.pipeline_mode<synchronous>, transform_indices = @transform_5, window_bounds = array<i64: 32, 64>}, {pipeline_mode = #tpu.pipeline_mode<synchronous>, transform_indices = @transform_6, window_bounds = array<i64: 24, 1>}, {pipeline_mode = #tpu.pipeline_mode<synchronous>, transform_indices = @transform_7, window_bounds = array<i64: 24, 1>}, {pipeline_mode = #tpu.pipeline_mode<synchronous>, transform_indices = @transform_8, window_bounds = array<i64: 16, 72>}, {pipeline_mode = #tpu.pipeline_mode<synchronous>, transform_indices = @transform_9, window_bounds = array<i64: 16, 1>}, {pipeline_mode = #tpu.pipeline_mode<synchronous>, transform_indices = @transform_10, window_bounds = array<i64: 64, 128>}, {pipeline_mode = #tpu.pipeline_mode<synchronous>, transform_indices = @transform_11, window_bounds = array<i64: 16, 1>}, {pipeline_mode = #tpu.pipeline_mode<synchronous>, transform_indices = @transform_12, window_bounds = array<i64: 16, 1>}, {pipeline_mode = #tpu.pipeline_mode<synchronous>, transform_indices = @transform_13, window_bounds = array<i64: 5, 144>}, {pipeline_mode = #tpu.pipeline_mode<synchronous>, transform_indices = @transform_14, window_bounds = array<i64: 5, 1>}, {transform_indices = @transform_15, window_bounds = array<i64: 1, 5, 128>}]} {
    %c0 = arith.constant 0 : index
    %c0_0 = arith.constant 0 : index
    %c0_1 = arith.constant 0 : index
    %0 = vector.load %arg1[%c0, %c0_0, %c0_1] : memref<1x32x32xf32, #tpu.memory_space<vmem>>, vector<1x32x32xf32>
    %1 = vector.shape_cast %0 : vector<1x32x32xf32> to vector<32x32xf32>
    %c0_2 = arith.constant 0 : index
    %c0_3 = arith.constant 0 : index
    %2 = vector.load %arg2[%c0_2, %c0_3] : memref<32x1xf32, #tpu.memory_space<vmem>>, vector<32x1xf32>
    %c0_4 = arith.constant 0 : index
    %c0_5 = arith.constant 0 : index
    %3 = vector.load %arg3[%c0_4, %c0_5] : memref<32x1xf32, #tpu.memory_space<vmem>>, vector<32x1xf32>
    %c0_6 = arith.constant 0 : index
    %c0_7 = arith.constant 0 : index
    %4 = vector.load %arg4[%c0_6, %c0_7] : memref<24x96xf32, #tpu.memory_space<vmem>>, vector<24x96xf32>
    %c0_8 = arith.constant 0 : index
    %c0_9 = arith.constant 0 : index
    %5 = vector.load %arg5[%c0_8, %c0_9] : memref<24x1xf32, #tpu.memory_space<vmem>>, vector<24x1xf32>
    %c0_10 = arith.constant 0 : index
    %c0_11 = arith.constant 0 : index
    %6 = vector.load %arg6[%c0_10, %c0_11] : memref<32x64xf32, #tpu.memory_space<vmem>>, vector<32x64xf32>
    %cst = arith.constant dense<0.000000e+00> : vector<32xf32>
    %7 = vector.multi_reduction <add>, %1, %cst [1] : vector<32x32xf32> to vector<32xf32>
    %8 = vector.shape_cast %7 : vector<32xf32> to vector<32x1xf32>
    %cst_12 = arith.constant 3.200000e+01 : f32
    %9 = vector.broadcast %cst_12 : f32 to vector<32x1xf32>
    %10 = arith.divf %8, %9 : vector<32x1xf32>
    %11 = vector.broadcast %10 : vector<32x1xf32> to vector<32x32xf32>
    %12 = arith.subf %1, %11 : vector<32x32xf32>
    %13 = arith.mulf %12, %12 : vector<32x32xf32>
    %cst_13 = arith.constant dense<0.000000e+00> : vector<32xf32>
    %14 = vector.multi_reduction <add>, %13, %cst_13 [1] : vector<32x32xf32> to vector<32xf32>
    %15 = vector.shape_cast %14 : vector<32xf32> to vector<32x1xf32>
    %cst_14 = arith.constant 3.200000e+01 : f32
    %16 = vector.broadcast %cst_14 : f32 to vector<32x1xf32>
    %17 = arith.divf %15, %16 : vector<32x1xf32>
    %cst_15 = arith.constant 9.99999974E-6 : f32
    %18 = vector.broadcast %cst_15 : f32 to vector<32x1xf32>
    %19 = arith.addf %17, %18 : vector<32x1xf32>
    %20 = math.rsqrt %19 : vector<32x1xf32>
    %21 = arith.mulf %20, %2 : vector<32x1xf32>
    %22 = arith.mulf %10, %21 : vector<32x1xf32>
    %23 = arith.subf %3, %22 : vector<32x1xf32>
    %24 = vector.broadcast %21 : vector<32x1xf32> to vector<32x32xf32>
    %25 = arith.mulf %1, %24 : vector<32x32xf32>
    %26 = vector.broadcast %23 : vector<32x1xf32> to vector<32x32xf32>
    %27 = arith.addf %25, %26 : vector<32x32xf32>
    %cst_16 = arith.constant 5.000000e-01 : f32
    %28 = vector.broadcast %cst_16 : f32 to vector<32x32xf32>
    %29 = arith.mulf %28, %27 : vector<32x32xf32>
    %cst_17 = arith.constant 0.707106769 : f32
    %30 = vector.broadcast %cst_17 : f32 to vector<32x32xf32>
    %31 = arith.mulf %27, %30 : vector<32x32xf32>
    %cst_18 = arith.constant 0.000000e+00 : f32
    %32 = vector.broadcast %cst_18 : f32 to vector<32x32xf32>
    %33 = arith.cmpf oge, %31, %32 : vector<32x32xf32>
    %cst_19 = arith.constant 1.000000e+00 : f32
    %cst_20 = arith.constant -1.000000e+00 : f32
    %34 = vector.broadcast %cst_19 : f32 to vector<32x32xf32>
    %35 = vector.broadcast %cst_20 : f32 to vector<32x32xf32>
    %36 = arith.select %33, %34, %35 : vector<32x32xi1>, vector<32x32xf32>
    %37 = math.absf %31 : vector<32x32xf32>
    %cst_21 = arith.constant 0.327591091 : f32
    %38 = vector.broadcast %cst_21 : f32 to vector<32x32xf32>
    %39 = arith.mulf %38, %37 : vector<32x32xf32>
    %cst_22 = arith.constant 1.000000e+00 : f32
    %40 = vector.broadcast %cst_22 : f32 to vector<32x32xf32>
    %41 = arith.addf %40, %39 : vector<32x32xf32>
    %cst_23 = arith.constant 1.000000e+00 : f32
    %42 = vector.broadcast %cst_23 : f32 to vector<32x32xf32>
    %43 = arith.divf %42, %41 : vector<32x32xf32>
    %cst_24 = arith.constant 1.06140542 : f32
    %44 = vector.broadcast %cst_24 : f32 to vector<32x32xf32>
    %45 = arith.mulf %44, %43 : vector<32x32xf32>
    %cst_25 = arith.constant -1.45315206 : f32
    %46 = vector.broadcast %cst_25 : f32 to vector<32x32xf32>
    %47 = arith.addf %45, %46 : vector<32x32xf32>
    %48 = arith.mulf %47, %43 : vector<32x32xf32>
    %cst_26 = arith.constant 1.42141378 : f32
    %49 = vector.broadcast %cst_26 : f32 to vector<32x32xf32>
    %50 = arith.addf %48, %49 : vector<32x32xf32>
    %51 = arith.mulf %50, %43 : vector<32x32xf32>
    %cst_27 = arith.constant -0.284496725 : f32
    %52 = vector.broadcast %cst_27 : f32 to vector<32x32xf32>
    %53 = arith.addf %51, %52 : vector<32x32xf32>
    %54 = arith.mulf %53, %43 : vector<32x32xf32>
    %cst_28 = arith.constant 0.254829586 : f32
    %55 = vector.broadcast %cst_28 : f32 to vector<32x32xf32>
    %56 = arith.addf %54, %55 : vector<32x32xf32>
    %57 = arith.mulf %56, %43 : vector<32x32xf32>
    %cst_29 = arith.constant 0.000000e+00 : f32
    %58 = vector.broadcast %cst_29 : f32 to vector<32x32xf32>
    %59 = arith.subf %58, %37 : vector<32x32xf32>
    %60 = arith.mulf %59, %37 : vector<32x32xf32>
    %61 = math.exp %60 : vector<32x32xf32>
    %62 = arith.mulf %57, %61 : vector<32x32xf32>
    %cst_30 = arith.constant 1.000000e+00 : f32
    %63 = vector.broadcast %cst_30 : f32 to vector<32x32xf32>
    %64 = arith.subf %63, %62 : vector<32x32xf32>
    %65 = arith.mulf %36, %64 : vector<32x32xf32>
    %cst_31 = arith.constant 1.000000e+00 : f32
    %66 = vector.broadcast %cst_31 : f32 to vector<32x32xf32>
    %67 = arith.addf %66, %65 : vector<32x32xf32>
    %68 = arith.mulf %29, %67 : vector<32x32xf32>
    %cst_32 = arith.constant 0.000000e+00 : f32
    %69 = vector.broadcast %cst_32 : f32 to vector<32x1xf32>
    %c0_33 = arith.constant 0 : index
    %c0_34 = arith.constant 0 : index
    %70 = vector.load %arg17[%c0_33, %c0_34] : memref<32x34xf32, #tpu.memory_space<vmem>>, vector<32x1xf32>
    tpu.vector_store %arg17[%c0_33, %c0_34], %69 {strides = array<i32>} : memref<32x34xf32, #tpu.memory_space<vmem>>, vector<32x1xf32>,
    %cst_35 = arith.constant 0.000000e+00 : f32
    %71 = vector.broadcast %cst_35 : f32 to vector<32x1xf32>
    %c0_36 = arith.constant 0 : index
    %c33 = arith.constant 33 : index
    %72 = vector.load %arg17[%c0_36, %c33] : memref<32x34xf32, #tpu.memory_space<vmem>>, vector<32x1xf32>
    tpu.vector_store %arg17[%c0_36, %c33], %71 {strides = array<i32>} : memref<32x34xf32, #tpu.memory_space<vmem>>, vector<32x1xf32>,
    %c0_37 = arith.constant 0 : index
    %c1 = arith.constant 1 : index
    %73 = vector.load %arg17[%c0_37, %c1] : memref<32x34xf32, #tpu.memory_space<vmem>>, vector<32x32xf32>
    tpu.vector_store %arg17[%c0_37, %c1], %68 {strides = array<i32>} : memref<32x34xf32, #tpu.memory_space<vmem>>, vector<32x32xf32>,
    %c0_38 = arith.constant 0 : index
    %c0_39 = arith.constant 0 : index
    %74 = vector.load %arg17[%c0_38, %c0_39] : memref<32x34xf32, #tpu.memory_space<vmem>>, vector<32x32xf32>
    %c0_40 = arith.constant 0 : index
    %c1_41 = arith.constant 1 : index
    %75 = vector.load %arg17[%c0_40, %c1_41] : memref<32x34xf32, #tpu.memory_space<vmem>>, vector<32x32xf32>
    %c0_42 = arith.constant 0 : index
    %c2 = arith.constant 2 : index
    %76 = vector.load %arg17[%c0_42, %c2] : memref<32x34xf32, #tpu.memory_space<vmem>>, vector<32x32xf32>
    %77 = tpu.concatenate %74, %75, %76 in 0 : vector<32x32xf32>, vector<32x32xf32>, vector<32x32xf32> -> vector<96x32xf32>
    %cst_43 = arith.constant dense<0.000000e+00> : vector<24x32xf32>
    %78 = tpu.matmul %4, %77, %cst_43 {dimension_numbers = #tpu.dot_dimension_numbers<[1], [0], [0], [1], [0, 0, 1, 1], [], []>} : vector<24x96xf32>, vector<96x32xf32>, vector<24x32xf32> -> vector<24x32xf32>
    %79 = vector.broadcast %5 : vector<24x1xf32> to vector<24x32xf32>
    %80 = arith.addf %78, %79 : vector<24x32xf32>
    %cst_44 = arith.constant dense<0.000000e+00> : vector<24x64xf32>
    %81 = tpu.matmul %80, %6, %cst_44 {dimension_numbers = #tpu.dot_dimension_numbers<[1], [0], [0], [1], [0, 0, 1, 1], [], []>} : vector<24x32xf32>, vector<32x64xf32>, vector<24x64xf32> -> vector<24x64xf32>
    %c0_45 = arith.constant 0 : index
    %c0_46 = arith.constant 0 : index
    %82 = vector.load %arg7[%c0_45, %c0_46] : memref<24x1xf32, #tpu.memory_space<vmem>>, vector<24x1xf32>
    %c0_47 = arith.constant 0 : index
    %c0_48 = arith.constant 0 : index
    %83 = vector.load %arg8[%c0_47, %c0_48] : memref<24x1xf32, #tpu.memory_space<vmem>>, vector<24x1xf32>
    %c0_49 = arith.constant 0 : index
    %c0_50 = arith.constant 0 : index
    %84 = vector.load %arg9[%c0_49, %c0_50] : memref<16x72xf32, #tpu.memory_space<vmem>>, vector<16x72xf32>
    %c0_51 = arith.constant 0 : index
    %c0_52 = arith.constant 0 : index
    %85 = vector.load %arg10[%c0_51, %c0_52] : memref<16x1xf32, #tpu.memory_space<vmem>>, vector<16x1xf32>
    %c0_53 = arith.constant 0 : index
    %c0_54 = arith.constant 0 : index
    %86 = vector.load %arg11[%c0_53, %c0_54] : memref<64x128xf32, #tpu.memory_space<vmem>>, vector<64x128xf32>
    %cst_55 = arith.constant dense<0.000000e+00> : vector<24xf32>
    %87 = vector.multi_reduction <add>, %81, %cst_55 [1] : vector<24x64xf32> to vector<24xf32>
    %88 = vector.shape_cast %87 : vector<24xf32> to vector<24x1xf32>
    %cst_56 = arith.constant 6.400000e+01 : f32
    %89 = vector.broadcast %cst_56 : f32 to vector<24x1xf32>
    %90 = arith.divf %88, %89 : vector<24x1xf32>
    %91 = vector.broadcast %90 : vector<24x1xf32> to vector<24x64xf32>
    %92 = arith.subf %81, %91 : vector<24x64xf32>
    %93 = arith.mulf %92, %92 : vector<24x64xf32>
    %cst_57 = arith.constant dense<0.000000e+00> : vector<24xf32>
    %94 = vector.multi_reduction <add>, %93, %cst_57 [1] : vector<24x64xf32> to vector<24xf32>
    %95 = vector.shape_cast %94 : vector<24xf32> to vector<24x1xf32>
    %cst_58 = arith.constant 6.400000e+01 : f32
    %96 = vector.broadcast %cst_58 : f32 to vector<24x1xf32>
    %97 = arith.divf %95, %96 : vector<24x1xf32>
    %cst_59 = arith.constant 9.99999974E-6 : f32
    %98 = vector.broadcast %cst_59 : f32 to vector<24x1xf32>
    %99 = arith.addf %97, %98 : vector<24x1xf32>
    %100 = math.rsqrt %99 : vector<24x1xf32>
    %101 = arith.mulf %100, %82 : vector<24x1xf32>
    %102 = arith.mulf %90, %101 : vector<24x1xf32>
    %103 = arith.subf %83, %102 : vector<24x1xf32>
    %104 = vector.broadcast %101 : vector<24x1xf32> to vector<24x64xf32>
    %105 = arith.mulf %81, %104 : vector<24x64xf32>
    %106 = vector.broadcast %103 : vector<24x1xf32> to vector<24x64xf32>
    %107 = arith.addf %105, %106 : vector<24x64xf32>
    %cst_60 = arith.constant 5.000000e-01 : f32
    %108 = vector.broadcast %cst_60 : f32 to vector<24x64xf32>
    %109 = arith.mulf %108, %107 : vector<24x64xf32>
    %cst_61 = arith.constant 0.707106769 : f32
    %110 = vector.broadcast %cst_61 : f32 to vector<24x64xf32>
    %111 = arith.mulf %107, %110 : vector<24x64xf32>
    %cst_62 = arith.constant 0.000000e+00 : f32
    %112 = vector.broadcast %cst_62 : f32 to vector<24x64xf32>
    %113 = arith.cmpf oge, %111, %112 : vector<24x64xf32>
    %cst_63 = arith.constant 1.000000e+00 : f32
    %cst_64 = arith.constant -1.000000e+00 : f32
    %114 = vector.broadcast %cst_63 : f32 to vector<24x64xf32>
    %115 = vector.broadcast %cst_64 : f32 to vector<24x64xf32>
    %116 = arith.select %113, %114, %115 : vector<24x64xi1>, vector<24x64xf32>
    %117 = math.absf %111 : vector<24x64xf32>
    %cst_65 = arith.constant 0.327591091 : f32
    %118 = vector.broadcast %cst_65 : f32 to vector<24x64xf32>
    %119 = arith.mulf %118, %117 : vector<24x64xf32>
    %cst_66 = arith.constant 1.000000e+00 : f32
    %120 = vector.broadcast %cst_66 : f32 to vector<24x64xf32>
    %121 = arith.addf %120, %119 : vector<24x64xf32>
    %cst_67 = arith.constant 1.000000e+00 : f32
    %122 = vector.broadcast %cst_67 : f32 to vector<24x64xf32>
    %123 = arith.divf %122, %121 : vector<24x64xf32>
    %cst_68 = arith.constant 1.06140542 : f32
    %124 = vector.broadcast %cst_68 : f32 to vector<24x64xf32>
    %125 = arith.mulf %124, %123 : vector<24x64xf32>
    %cst_69 = arith.constant -1.45315206 : f32
    %126 = vector.broadcast %cst_69 : f32 to vector<24x64xf32>
    %127 = arith.addf %125, %126 : vector<24x64xf32>
    %128 = arith.mulf %127, %123 : vector<24x64xf32>
    %cst_70 = arith.constant 1.42141378 : f32
    %129 = vector.broadcast %cst_70 : f32 to vector<24x64xf32>
    %130 = arith.addf %128, %129 : vector<24x64xf32>
    %131 = arith.mulf %130, %123 : vector<24x64xf32>
    %cst_71 = arith.constant -0.284496725 : f32
    %132 = vector.broadcast %cst_71 : f32 to vector<24x64xf32>
    %133 = arith.addf %131, %132 : vector<24x64xf32>
    %134 = arith.mulf %133, %123 : vector<24x64xf32>
    %cst_72 = arith.constant 0.254829586 : f32
    %135 = vector.broadcast %cst_72 : f32 to vector<24x64xf32>
    %136 = arith.addf %134, %135 : vector<24x64xf32>
    %137 = arith.mulf %136, %123 : vector<24x64xf32>
    %cst_73 = arith.constant 0.000000e+00 : f32
    %138 = vector.broadcast %cst_73 : f32 to vector<24x64xf32>
    %139 = arith.subf %138, %117 : vector<24x64xf32>
    %140 = arith.mulf %139, %117 : vector<24x64xf32>
    %141 = math.exp %140 : vector<24x64xf32>
    %142 = arith.mulf %137, %141 : vector<24x64xf32>
    %cst_74 = arith.constant 1.000000e+00 : f32
    %143 = vector.broadcast %cst_74 : f32 to vector<24x64xf32>
    %144 = arith.subf %143, %142 : vector<24x64xf32>
    %145 = arith.mulf %116, %144 : vector<24x64xf32>
    %cst_75 = arith.constant 1.000000e+00 : f32
    %146 = vector.broadcast %cst_75 : f32 to vector<24x64xf32>
    %147 = arith.addf %146, %145 : vector<24x64xf32>
    %148 = arith.mulf %109, %147 : vector<24x64xf32>
    %cst_76 = arith.constant 0.000000e+00 : f32
    %149 = vector.broadcast %cst_76 : f32 to vector<24x1xf32>
    %c0_77 = arith.constant 0 : index
    %c0_78 = arith.constant 0 : index
    %150 = vector.load %arg18[%c0_77, %c0_78] : memref<24x66xf32, #tpu.memory_space<vmem>>, vector<24x1xf32>
    tpu.vector_store %arg18[%c0_77, %c0_78], %149 {strides = array<i32>} : memref<24x66xf32, #tpu.memory_space<vmem>>, vector<24x1xf32>,
    %cst_79 = arith.constant 0.000000e+00 : f32
    %151 = vector.broadcast %cst_79 : f32 to vector<24x1xf32>
    %c0_80 = arith.constant 0 : index
    %c65 = arith.constant 65 : index
    %152 = vector.load %arg18[%c0_80, %c65] : memref<24x66xf32, #tpu.memory_space<vmem>>, vector<24x1xf32>
    tpu.vector_store %arg18[%c0_80, %c65], %151 {strides = array<i32>} : memref<24x66xf32, #tpu.memory_space<vmem>>, vector<24x1xf32>,
    %c0_81 = arith.constant 0 : index
    %c1_82 = arith.constant 1 : index
    %153 = vector.load %arg18[%c0_81, %c1_82] : memref<24x66xf32, #tpu.memory_space<vmem>>, vector<24x64xf32>
    tpu.vector_store %arg18[%c0_81, %c1_82], %148 {strides = array<i32>} : memref<24x66xf32, #tpu.memory_space<vmem>>, vector<24x64xf32>,
    %c0_83 = arith.constant 0 : index
    %c0_84 = arith.constant 0 : index
    %154 = vector.load %arg18[%c0_83, %c0_84] : memref<24x66xf32, #tpu.memory_space<vmem>>, vector<24x64xf32>
    %c0_85 = arith.constant 0 : index
    %c1_86 = arith.constant 1 : index
    %155 = vector.load %arg18[%c0_85, %c1_86] : memref<24x66xf32, #tpu.memory_space<vmem>>, vector<24x64xf32>
    %c0_87 = arith.constant 0 : index
    %c2_88 = arith.constant 2 : index
    %156 = vector.load %arg18[%c0_87, %c2_88] : memref<24x66xf32, #tpu.memory_space<vmem>>, vector<24x64xf32>
    %157 = tpu.concatenate %154, %155, %156 in 0 : vector<24x64xf32>, vector<24x64xf32>, vector<24x64xf32> -> vector<72x64xf32>
    %cst_89 = arith.constant dense<0.000000e+00> : vector<16x64xf32>
    %158 = tpu.matmul %84, %157, %cst_89 {dimension_numbers = #tpu.dot_dimension_numbers<[1], [0], [0], [1], [0, 0, 1, 1], [], []>} : vector<16x72xf32>, vector<72x64xf32>, vector<16x64xf32> -> vector<16x64xf32>
    %159 = vector.broadcast %85 : vector<16x1xf32> to vector<16x64xf32>
    %160 = arith.addf %158, %159 : vector<16x64xf32>
    %cst_90 = arith.constant dense<0.000000e+00> : vector<16x128xf32>
    %161 = tpu.matmul %160, %86, %cst_90 {dimension_numbers = #tpu.dot_dimension_numbers<[1], [0], [0], [1], [0, 0, 1, 1], [], []>} : vector<16x64xf32>, vector<64x128xf32>, vector<16x128xf32> -> vector<16x128xf32>
    %c0_91 = arith.constant 0 : index
    %c0_92 = arith.constant 0 : index
    %162 = vector.load %arg12[%c0_91, %c0_92] : memref<16x1xf32, #tpu.memory_space<vmem>>, vector<16x1xf32>
    %c0_93 = arith.constant 0 : index
    %c0_94 = arith.constant 0 : index
    %163 = vector.load %arg13[%c0_93, %c0_94] : memref<16x1xf32, #tpu.memory_space<vmem>>, vector<16x1xf32>
    %c0_95 = arith.constant 0 : index
    %c0_96 = arith.constant 0 : index
    %164 = vector.load %arg14[%c0_95, %c0_96] : memref<5x144xf32, #tpu.memory_space<vmem>>, vector<5x144xf32>
    %c0_97 = arith.constant 0 : index
    %c0_98 = arith.constant 0 : index
    %165 = vector.load %arg15[%c0_97, %c0_98] : memref<5x1xf32, #tpu.memory_space<vmem>>, vector<5x1xf32>
    %cst_99 = arith.constant dense<0.000000e+00> : vector<16xf32>
    %166 = vector.multi_reduction <add>, %161, %cst_99 [1] : vector<16x128xf32> to vector<16xf32>
    %167 = vector.shape_cast %166 : vector<16xf32> to vector<16x1xf32>
    %cst_100 = arith.constant 1.280000e+02 : f32
    %168 = vector.broadcast %cst_100 : f32 to vector<16x1xf32>
    %169 = arith.divf %167, %168 : vector<16x1xf32>
    %170 = vector.broadcast %169 : vector<16x1xf32> to vector<16x128xf32>
    %171 = arith.subf %161, %170 : vector<16x128xf32>
    %172 = arith.mulf %171, %171 : vector<16x128xf32>
    %cst_101 = arith.constant dense<0.000000e+00> : vector<16xf32>
    %173 = vector.multi_reduction <add>, %172, %cst_101 [1] : vector<16x128xf32> to vector<16xf32>
    %174 = vector.shape_cast %173 : vector<16xf32> to vector<16x1xf32>
    %cst_102 = arith.constant 1.280000e+02 : f32
    %175 = vector.broadcast %cst_102 : f32 to vector<16x1xf32>
    %176 = arith.divf %174, %175 : vector<16x1xf32>
    %cst_103 = arith.constant 9.99999974E-6 : f32
    %177 = vector.broadcast %cst_103 : f32 to vector<16x1xf32>
    %178 = arith.addf %176, %177 : vector<16x1xf32>
    %179 = math.rsqrt %178 : vector<16x1xf32>
    %180 = arith.mulf %179, %162 : vector<16x1xf32>
    %181 = arith.mulf %169, %180 : vector<16x1xf32>
    %182 = arith.subf %163, %181 : vector<16x1xf32>
    %183 = vector.broadcast %180 : vector<16x1xf32> to vector<16x128xf32>
    %184 = arith.mulf %161, %183 : vector<16x128xf32>
    %185 = vector.broadcast %182 : vector<16x1xf32> to vector<16x128xf32>
    %186 = arith.addf %184, %185 : vector<16x128xf32>
    %cst_104 = arith.constant 5.000000e-01 : f32
    %187 = vector.broadcast %cst_104 : f32 to vector<16x128xf32>
    %188 = arith.mulf %187, %186 : vector<16x128xf32>
    %cst_105 = arith.constant 0.707106769 : f32
    %189 = vector.broadcast %cst_105 : f32 to vector<16x128xf32>
    %190 = arith.mulf %186, %189 : vector<16x128xf32>
    %cst_106 = arith.constant 0.000000e+00 : f32
    %191 = vector.broadcast %cst_106 : f32 to vector<16x128xf32>
    %192 = arith.cmpf oge, %190, %191 : vector<16x128xf32>
    %cst_107 = arith.constant 1.000000e+00 : f32
    %cst_108 = arith.constant -1.000000e+00 : f32
    %193 = vector.broadcast %cst_107 : f32 to vector<16x128xf32>
    %194 = vector.broadcast %cst_108 : f32 to vector<16x128xf32>
    %195 = arith.select %192, %193, %194 : vector<16x128xi1>, vector<16x128xf32>
    %196 = math.absf %190 : vector<16x128xf32>
    %cst_109 = arith.constant 0.327591091 : f32
    %197 = vector.broadcast %cst_109 : f32 to vector<16x128xf32>
    %198 = arith.mulf %197, %196 : vector<16x128xf32>
    %cst_110 = arith.constant 1.000000e+00 : f32
    %199 = vector.broadcast %cst_110 : f32 to vector<16x128xf32>
    %200 = arith.addf %199, %198 : vector<16x128xf32>
    %cst_111 = arith.constant 1.000000e+00 : f32
    %201 = vector.broadcast %cst_111 : f32 to vector<16x128xf32>
    %202 = arith.divf %201, %200 : vector<16x128xf32>
    %cst_112 = arith.constant 1.06140542 : f32
    %203 = vector.broadcast %cst_112 : f32 to vector<16x128xf32>
    %204 = arith.mulf %203, %202 : vector<16x128xf32>
    %cst_113 = arith.constant -1.45315206 : f32
    %205 = vector.broadcast %cst_113 : f32 to vector<16x128xf32>
    %206 = arith.addf %204, %205 : vector<16x128xf32>
    %207 = arith.mulf %206, %202 : vector<16x128xf32>
    %cst_114 = arith.constant 1.42141378 : f32
    %208 = vector.broadcast %cst_114 : f32 to vector<16x128xf32>
    %209 = arith.addf %207, %208 : vector<16x128xf32>
    %210 = arith.mulf %209, %202 : vector<16x128xf32>
    %cst_115 = arith.constant -0.284496725 : f32
    %211 = vector.broadcast %cst_115 : f32 to vector<16x128xf32>
    %212 = arith.addf %210, %211 : vector<16x128xf32>
    %213 = arith.mulf %212, %202 : vector<16x128xf32>
    %cst_116 = arith.constant 0.254829586 : f32
    %214 = vector.broadcast %cst_116 : f32 to vector<16x128xf32>
    %215 = arith.addf %213, %214 : vector<16x128xf32>
    %216 = arith.mulf %215, %202 : vector<16x128xf32>
    %cst_117 = arith.constant 0.000000e+00 : f32
    %217 = vector.broadcast %cst_117 : f32 to vector<16x128xf32>
    %218 = arith.subf %217, %196 : vector<16x128xf32>
    %219 = arith.mulf %218, %196 : vector<16x128xf32>
    %220 = math.exp %219 : vector<16x128xf32>
    %221 = arith.mulf %216, %220 : vector<16x128xf32>
    %cst_118 = arith.constant 1.000000e+00 : f32
    %222 = vector.broadcast %cst_118 : f32 to vector<16x128xf32>
    %223 = arith.subf %222, %221 : vector<16x128xf32>
    %224 = arith.mulf %195, %223 : vector<16x128xf32>
    %cst_119 = arith.constant 1.000000e+00 : f32
    %225 = vector.broadcast %cst_119 : f32 to vector<16x128xf32>
    %226 = arith.addf %225, %224 : vector<16x128xf32>
    %227 = arith.mulf %188, %226 : vector<16x128xf32>
    %cst_120 = arith.constant 0.000000e+00 : f32
    %228 = vector.broadcast %cst_120 : f32 to vector<16x4xf32>
    %c0_121 = arith.constant 0 : index
    %c0_122 = arith.constant 0 : index
    %229 = vector.load %arg19[%c0_121, %c0_122] : memref<16x136xf32, #tpu.memory_space<vmem>>, vector<16x4xf32>
    tpu.vector_store %arg19[%c0_121, %c0_122], %228 {strides = array<i32>} : memref<16x136xf32, #tpu.memory_space<vmem>>, vector<16x4xf32>,
    %cst_123 = arith.constant 0.000000e+00 : f32
    %230 = vector.broadcast %cst_123 : f32 to vector<16x4xf32>
    %c0_124 = arith.constant 0 : index
    %c132 = arith.constant 132 : index
    %231 = vector.load %arg19[%c0_124, %c132] : memref<16x136xf32, #tpu.memory_space<vmem>>, vector<16x4xf32>
    tpu.vector_store %arg19[%c0_124, %c132], %230 {strides = array<i32>} : memref<16x136xf32, #tpu.memory_space<vmem>>, vector<16x4xf32>,
    %c0_125 = arith.constant 0 : index
    %c4 = arith.constant 4 : index
    %232 = vector.load %arg19[%c0_125, %c4] : memref<16x136xf32, #tpu.memory_space<vmem>>, vector<16x128xf32>
    tpu.vector_store %arg19[%c0_125, %c4], %227 {strides = array<i32>} : memref<16x136xf32, #tpu.memory_space<vmem>>, vector<16x128xf32>,
    %c0_126 = arith.constant 0 : index
    %c0_127 = arith.constant 0 : index
    %233 = vector.load %arg19[%c0_126, %c0_127] : memref<16x136xf32, #tpu.memory_space<vmem>>, vector<16x128xf32>
    %c0_128 = arith.constant 0 : index
    %c1_129 = arith.constant 1 : index
    %234 = vector.load %arg19[%c0_128, %c1_129] : memref<16x136xf32, #tpu.memory_space<vmem>>, vector<16x128xf32>
    %c0_130 = arith.constant 0 : index
    %c2_131 = arith.constant 2 : index
    %235 = vector.load %arg19[%c0_130, %c2_131] : memref<16x136xf32, #tpu.memory_space<vmem>>, vector<16x128xf32>
    %c0_132 = arith.constant 0 : index
    %c3 = arith.constant 3 : index
    %236 = vector.load %arg19[%c0_132, %c3] : memref<16x136xf32, #tpu.memory_space<vmem>>, vector<16x128xf32>
    %c0_133 = arith.constant 0 : index
    %c4_134 = arith.constant 4 : index
    %237 = vector.load %arg19[%c0_133, %c4_134] : memref<16x136xf32, #tpu.memory_space<vmem>>, vector<16x128xf32>
    %c0_135 = arith.constant 0 : index
    %c5 = arith.constant 5 : index
    %238 = vector.load %arg19[%c0_135, %c5] : memref<16x136xf32, #tpu.memory_space<vmem>>, vector<16x128xf32>
    %c0_136 = arith.constant 0 : index
    %c6 = arith.constant 6 : index
    %239 = vector.load %arg19[%c0_136, %c6] : memref<16x136xf32, #tpu.memory_space<vmem>>, vector<16x128xf32>
    %c0_137 = arith.constant 0 : index
    %c7 = arith.constant 7 : index
    %240 = vector.load %arg19[%c0_137, %c7] : memref<16x136xf32, #tpu.memory_space<vmem>>, vector<16x128xf32>
    %c0_138 = arith.constant 0 : index
    %c8 = arith.constant 8 : index
    %241 = vector.load %arg19[%c0_138, %c8] : memref<16x136xf32, #tpu.memory_space<vmem>>, vector<16x128xf32>
    %242 = tpu.concatenate %233, %234, %235, %236, %237, %238, %239, %240, %241 in 0 : vector<16x128xf32>, vector<16x128xf32>, vector<16x128xf32>, vector<16x128xf32>, vector<16x128xf32>, vector<16x128xf32>, vector<16x128xf32>, vector<16x128xf32>, vector<16x128xf32> -> vector<144x128xf32>
    %cst_139 = arith.constant dense<0.000000e+00> : vector<5x128xf32>
    %243 = tpu.matmul %164, %242, %cst_139 {dimension_numbers = #tpu.dot_dimension_numbers<[1], [0], [0], [1], [0, 0, 1, 1], [], []>} : vector<5x144xf32>, vector<144x128xf32>, vector<5x128xf32> -> vector<5x128xf32>
    %244 = vector.broadcast %165 : vector<5x1xf32> to vector<5x128xf32>
    %245 = arith.addf %243, %244 : vector<5x128xf32>
    %c0_140 = arith.constant 0 : index
    %c0_141 = arith.constant 0 : index
    %c0_142 = arith.constant 0 : index
    %246 = vector.load %arg16[%c0_140, %c0_141, %c0_142] : memref<1x5x128xf32, #tpu.memory_space<vmem>>, vector<1x5x128xf32>
    %247 = vector.shape_cast %246 : vector<1x5x128xf32> to vector<5x128xf32>
    %248 = vector.shape_cast %245 : vector<5x128xf32> to vector<1x5x128xf32>
    tpu.vector_store %arg16[%c0_140, %c0_141, %c0_142], %248 {strides = array<i32>} : memref<1x5x128xf32, #tpu.memory_space<vmem>>, vector<1x5x128xf32>,
    return
  }
  func.func @transform_0(%arg0: i32) -> (i32, i32, i32) {
    %c0_i32 = arith.constant 0 : i32
    %c0_i32_0 = arith.constant 0 : i32
    %c0_i32_1 = arith.constant 0 : i32
    return %arg0, %c0_i32, %c0_i32_0 : i32, i32, i32
  }
  func.func @transform_1(%arg0: i32) -> (i32, i32) {
    %c0_i32 = arith.constant 0 : i32
    %c0_i32_0 = arith.constant 0 : i32
    %c0_i32_1 = arith.constant 0 : i32
    return %c0_i32, %c0_i32_0 : i32, i32
  }
  func.func @transform_2(%arg0: i32) -> (i32, i32) {
    %c0_i32 = arith.constant 0 : i32
    %c0_i32_0 = arith.constant 0 : i32
    %c0_i32_1 = arith.constant 0 : i32
    return %c0_i32, %c0_i32_0 : i32, i32
  }
  func.func @transform_3(%arg0: i32) -> (i32, i32) {
    %c0_i32 = arith.constant 0 : i32
    %c0_i32_0 = arith.constant 0 : i32
    %c0_i32_1 = arith.constant 0 : i32
    return %c0_i32, %c0_i32_0 : i32, i32
  }
  func.func @transform_4(%arg0: i32) -> (i32, i32) {
    %c0_i32 = arith.constant 0 : i32
    %c0_i32_0 = arith.constant 0 : i32
    %c0_i32_1 = arith.constant 0 : i32
    return %c0_i32, %c0_i32_0 : i32, i32
  }
  func.func @transform_5(%arg0: i32) -> (i32, i32) {
    %c0_i32 = arith.constant 0 : i32
    %c0_i32_0 = arith.constant 0 : i32
    %c0_i32_1 = arith.constant 0 : i32
    return %c0_i32, %c0_i32_0 : i32, i32
  }
  func.func @transform_6(%arg0: i32) -> (i32, i32) {
    %c0_i32 = arith.constant 0 : i32
    %c0_i32_0 = arith.constant 0 : i32
    %c0_i32_1 = arith.constant 0 : i32
    return %c0_i32, %c0_i32_0 : i32, i32
  }
  func.func @transform_7(%arg0: i32) -> (i32, i32) {
    %c0_i32 = arith.constant 0 : i32
    %c0_i32_0 = arith.constant 0 : i32
    %c0_i32_1 = arith.constant 0 : i32
    return %c0_i32, %c0_i32_0 : i32, i32
  }
  func.func @transform_8(%arg0: i32) -> (i32, i32) {
    %c0_i32 = arith.constant 0 : i32
    %c0_i32_0 = arith.constant 0 : i32
    %c0_i32_1 = arith.constant 0 : i32
    return %c0_i32, %c0_i32_0 : i32, i32
  }
  func.func @transform_9(%arg0: i32) -> (i32, i32) {
    %c0_i32 = arith.constant 0 : i32
    %c0_i32_0 = arith.constant 0 : i32
    %c0_i32_1 = arith.constant 0 : i32
    return %c0_i32, %c0_i32_0 : i32, i32
  }
  func.func @transform_10(%arg0: i32) -> (i32, i32) {
    %c0_i32 = arith.constant 0 : i32
    %c0_i32_0 = arith.constant 0 : i32
    %c0_i32_1 = arith.constant 0 : i32
    return %c0_i32, %c0_i32_0 : i32, i32
  }
  func.func @transform_11(%arg0: i32) -> (i32, i32) {
    %c0_i32 = arith.constant 0 : i32
    %c0_i32_0 = arith.constant 0 : i32
    %c0_i32_1 = arith.constant 0 : i32
    return %c0_i32, %c0_i32_0 : i32, i32
  }
  func.func @transform_12(%arg0: i32) -> (i32, i32) {
    %c0_i32 = arith.constant 0 : i32
    %c0_i32_0 = arith.constant 0 : i32
    %c0_i32_1 = arith.constant 0 : i32
    return %c0_i32, %c0_i32_0 : i32, i32
  }
  func.func @transform_13(%arg0: i32) -> (i32, i32) {
    %c0_i32 = arith.constant 0 : i32
    %c0_i32_0 = arith.constant 0 : i32
    %c0_i32_1 = arith.constant 0 : i32
    return %c0_i32, %c0_i32_0 : i32, i32
  }
  func.func @transform_14(%arg0: i32) -> (i32, i32) {
    %c0_i32 = arith.constant 0 : i32
    %c0_i32_0 = arith.constant 0 : i32
    %c0_i32_1 = arith.constant 0 : i32
    return %c0_i32, %c0_i32_0 : i32, i32
  }
  func.func @transform_15(%arg0: i32) -> (i32, i32, i32) {
    %c0_i32 = arith.constant 0 : i32
    %c0_i32_0 = arith.constant 0 : i32
    %c0_i32_1 = arith.constant 0 : i32
    return %arg0, %c0_i32, %c0_i32_0 : i32, i32, i32
  }
}

</mosaic_0001>

<bundles_post_ra>
// kernel: tpu_custom_call.1
= control target key start
LH: loop header
LB: loop body
LE: loop exit
PB: predicated region body
PF: predicated region fallthrough
CT: control target
= control target key end

     0   :  { %s2298_s18 = smov 0   ;;  %s2643_s0 = inlined_call_operand.vmem [shape: f32[2,32,32], index: 0, kind: input, shape index: {}]   ;;  %s2644_s1 = inlined_call_operand.vmem [shape: f32[32,1], index: 1, kind: input, shape index: {}]   ;;  %s2645_s2 = inlined_call_operand.vmem [shape: f32[32,1], index: 2, kind: input, shape index: {}]   ;;  %s2646_s3 = inlined_call_operand.vmem [shape: f32[24,96], index: 3, kind: input, shape index: {}]   ;;  %s2647_s4 = inlined_call_operand.vmem [shape: f32[24,1], index: 4, kind: input, shape index: {}]   ;;  %s2648_s5 = inlined_call_operand.vmem [shape: f32[32,64], index: 5, kind: input, shape index: {}]   ;;  %s2649_s6 = inlined_call_operand.vmem [shape: f32[24,1], index: 6, kind: input, shape index: {}]   ;;  %s2650_s7 = inlined_call_operand.vmem [shape: f32[24,1], index: 7, kind: input, shape index: {}]   ;;  %s2651_s8 = inlined_call_operand.vmem [shape: f32[16,72], index: 8, kind: input, shape index: {}]   ;;  %s2652_s9 = inlined_call_operand.vmem [shape: f32[16,1], index: 9, kind: input, shape index: {}]   ;;  %s2653_s10 = inlined_call_operand.vmem [shape: f32[64,128], index: 10, kind: input, shape index: {}]   ;;  %s2654_s11 = inlined_call_operand.vmem [shape: f32[16,1], index: 11, kind: input, shape index: {}]   ;;  %s2655_s12 = inlined_call_operand.vmem [shape: f32[16,1], index: 12, kind: input, shape index: {}]   ;;  %s2656_s13 = inlined_call_operand.vmem [shape: f32[5,144], index: 13, kind: input, shape index: {}]   ;;  %s2657_s14 = inlined_call_operand.vmem [shape: f32[5,1], index: 14, kind: input, shape index: {}]   ;;  %s2658_s15 = inlined_call_operand.vmem [shape: f32[2,5,128], index: 15, kind: output, shape index: {}]  }
   0x1 LB: > { %s1768_s19 = sadd.s32 4294967295, %s2201_s18   ;;  %p1772_p0 = scmp.ge.s32.totalorder %s2201_s18, 1  ;;  %s2201_s18 = sphi %s2298_s18, %s25_s18  }
   0x2   : > { %p437_p1 = scmp.lt.s32.totalorder %s2201_s18, 3 }
   0x4   : > { %p438_p2 = pnand %p1772_p0, %p437_p1 }
   0x5   : > { %p484_p3 = scmp.lt.s32.totalorder (!%p438_p2), %s1768_s19, 1  ;;  %vm515_vm0 = vcmask (!%p438_p2), 261120   ;;  %v2203_v28 = vmov (!%p438_p2), 0   ;;  %v497_v41 = vld [vmem:[%s2644_s1] sm:$0xff] (!%p438_p2)  ;;  %v498_v44 = vld [vmem:[%s2644_s1 + $0x8] sm:$0xff] (!%p438_p2)  ;;  %v499_v48 = vld [vmem:[%s2644_s1 + $0x10] sm:$0xff] (!%p438_p2) }
   0x6   : > { %441 = sbr.rel (%p438_p2) target bundleno = 3375 (0xd2f), region = 80  ;;  %2029 = vset.pattern.permute.xlu0 (!%p438_p2), %v2203_v28  ;;  %2030 = vset.pattern.permute.xlu1 (!%p438_p2), %v2203_v28  ;;  %v500_v51 = vld [vmem:[%s2644_s1 + $0x18] sm:$0xff] (!%p438_p2)  ;;  %v501_v54 = vld [vmem:[%s2645_s2] sm:$0xff] (!%p438_p2)  ;;  %v502_v57 = vld [vmem:[%s2645_s2 + $0x8] sm:$0xff] (!%p438_p2)  ;;  %vm733_vm1 = vcmask (!%p438_p2), 7168   ;;  %vm738_vm2 = vcmask (!%p438_p2), 277768  }
   0x7   : > { %v503_v60 = vld [vmem:[%s2645_s2 + $0x10] sm:$0xff] (!%p438_p2)  ;;  %v504_v63 = vld [vmem:[%s2645_s2 + $0x18] sm:$0xff] (!%p438_p2)  ;;  %s2206_s27 = smov (!%p438_p2), 1   ;;  %vm759_vm7 = vcmask (!%p438_p2), 269320   ;;  %s2208_s28 = smov (!%p438_p2), 127   ;;  %vm2210_vm8 = vmmov (!%p438_p2), 0  }
   0x8   : > { %s2209_s29 = smov (!%p438_p2), 126   ;;  %vm811_vm9 = vcmask (!%p438_p2), 785408   ;;  %vm1008_vm10 = vcmask (!%p438_p2), 523264   ;;  %vm1175_vm11 = vcmask (!%p438_p2), 540168   ;;  %vm1191_vm15 = vcmask (!%p438_p2), 531464   ;;  %s2211_s16 = smov (!%p438_p2), 4  }
   0x9   : > { %s2212_s17 = smov (!%p438_p2), 125   ;;  %s2215_s21 = smov (!%p438_p2), 122  }
   0xd   : > { %s2660_s19 = smov (!%p484_p3, %s1768_s19), 1 }
   0xe   : > { %s1789_s20 = sshll.u32 %s2660_s19, 5 }
   0xf   : > { %s488_s23 = scalar_lea.vmem %s2643_s0, %s1789_s20  ;;  %s2213_s20 = smov 124  }
  0x10   : > { %v2312_v0 = vld [vmem:[%s488_s23] sm:$0xff]  ;;  %v2314_v1 = vld [vmem:[%s488_s23 + $0x10] sm:$0xff]  ;;  %v2316_v2 = vld [vmem:[%s488_s23 + $0x8] sm:$0xff] }
  0x11   : > { %v516_v3 = vsel %vm515_vm0, %v2312_v0, 0.0  ;;  %v522_v4 = vsel %vm515_vm0, %v2314_v1, 0.0  ;;  %v2322_v5 = vld [vmem:[%s488_s23 + $0x18] sm:$0xff]  ;;  %v519_v6 = vsel %vm515_vm0, %v2316_v2, 0.0  ;;  %s2216_s23 = smov 121  }
  0x12   : > { %517 = vadd.xlane.f32.xlu0 %v516_v3  ;;  %523 = vadd.xlane.f32.xlu1 %v522_v4  ;;  %v525_v7 = vsel %vm515_vm0, %v2322_v5, 0.0  ;;  %v2204_v4 = vmov 0.0  }
  0x13   : > { %734 = vst.msk [vmem:[#allocation2] sm:$0xff] %vm733_vm1, %v2204_v4  ;;  %735 = vst.msk [vmem:[#allocation2 + $0x8] sm:$0xff] %vm733_vm1, %v2204_v4  ;;  %1857 = vmatprep.mubr.msk.f32.mxu0 %vm2210_vm8, %v2204_v4 }
  0x14   : > { %736 = vst.msk [vmem:[#allocation2 + $0x10] sm:$0xff] %vm733_vm1, %v2204_v4  ;;  %737 = vst.msk [vmem:[#allocation2 + $0x18] sm:$0xff] %vm733_vm1, %v2204_v4 }
  0x15   : > { %1172 = vst.msk [vmem:[#allocation3] sm:$0xff] %vm733_vm1, %v2204_v4  ;;  %1173 = vst.msk [vmem:[#allocation3 + $0x8] sm:$0xff] %vm733_vm1, %v2204_v4 }
  0x16   : > { %520 = vadd.xlane.f32.xlu0 %v519_v6  ;;  %526 = vadd.xlane.f32.xlu1 %v525_v7  ;;  %1174 = vst.msk [vmem:[#allocation3 + $0x10] sm:$0xff] %vm733_vm1, %v2204_v4  ;;  %vm1504_vm1 = vcmask 31744  }
  0x17   : > { %739 = vst.msk [vmem:[#allocation2] sm:$0xff] %vm738_vm2, %v2204_v4  ;;  %740 = vst.msk [vmem:[#allocation2 + $0x8] sm:$0xff] %vm738_vm2, %v2204_v4 }
  0x18   : > { %741 = vst.msk [vmem:[#allocation2 + $0x10] sm:$0xff] %vm738_vm2, %v2204_v4  ;;  %742 = vst.msk [vmem:[#allocation2 + $0x18] sm:$0xff] %vm738_vm2, %v2204_v4  ;;  %vm1507_vm2 = vcmask 64544  }
  0x19   : > { %1176 = vst.msk [vmem:[#allocation3] sm:$0xff] %vm1175_vm11, %v2204_v4  ;;  %1177 = vst.msk [vmem:[#allocation3 + $0x8] sm:$0xff] %vm1175_vm11, %v2204_v4 }
  0x1a   : > { %1178 = vst.msk [vmem:[#allocation3 + $0x10] sm:$0xff] %vm1175_vm11, %v2204_v4  ;;  %vm1591_vm11 = vcmask 1006592  }
  0x1b   : > { %1505 = vst.msk [vmem:[#allocation4] sm:$0xff] %vm1504_vm1, %v2204_v4  ;;  %1506 = vst.msk [vmem:[#allocation4 + $0x10] sm:$0xff] %vm1504_vm1, %v2204_v4 }
  0x1c   : > { %1508 = vst.msk [vmem:[#allocation4 + $0x8] sm:$0xff] %vm1507_vm2, %v2204_v4  ;;  %1509 = vst.msk [vmem:[#allocation4 + $0x18] sm:$0xff] %vm1507_vm2, %v2204_v4 }
  0x9f   : > { %v518_v8 = vpop.xlane.xlu0 %517  ;;  %v524_v9 = vpop.xlane.xlu1 %523 }
  0xa0   : > { %v529_v10 = vmul.f32 0.03125, %v518_v8  ;;  %v2328_v11 = vmul.f32 0.03125, %v524_v9 }
  0xa2   : > { %v533_v12 = vsub.f32 %v2312_v0, %v529_v10  ;;  %v535_v13 = vsub.f32 %v2314_v1, %v2328_v11 }
  0xa3   : > { %v521_v14 = vpop.xlane.xlu0 %520  ;;  %v527_v15 = vpop.xlane.xlu1 %526 }
  0xa4   : > { %v530_v16 = vmul.f32 0.03125, %v521_v14  ;;  %v532_v17 = vmul.f32 0.03125, %v527_v15  ;;  %v537_v18 = vmul.f32 %v533_v12, %v533_v12  ;;  %v539_v19 = vmul.f32 %v535_v13, %v535_v13 }
  0xa6   : > { %v534_v20 = vsub.f32 %v2316_v2, %v530_v16  ;;  %v536_v21 = vsub.f32 %v2322_v5, %v532_v17  ;;  %v541_v22 = vsel %vm515_vm0, %v537_v18, 0.0  ;;  %v547_v23 = vsel %vm515_vm0, %v539_v19, 0.0 }
  0xa7   : > { %542 = vadd.xlane.f32.xlu0 %v541_v22 }
  0xa8   : > { %v538_v24 = vmul.f32 %v534_v20, %v534_v20  ;;  %v540_v25 = vmul.f32 %v536_v21, %v536_v21 }
  0xaa   : > { %v544_v26 = vsel %vm515_vm0, %v538_v24, 0.0  ;;  %v550_v27 = vsel %vm515_vm0, %v540_v25, 0.0 }
  0xab   : > { %548 = vadd.xlane.f32.xlu0 %v547_v23  ;;  %545 = vadd.xlane.f32.xlu1 %v544_v26 }
  0xaf   : > { %551 = vadd.xlane.f32.xlu1 %v550_v27 }
 0x134   : > { %v543_v29 = vpop.xlane.xlu0 %542 }
 0x135   : > { %v553_v30 = vmul.f32 0.03125, %v543_v29 }
 0x137   : > { %v557_v31 = vadd.f32 1e-05, %v553_v30 }
 0x138   : > { %v546_v32 = vpop.xlane.xlu1 %545  ;;  %v549_v33 = vpop.xlane.xlu0 %548 }
 0x139   : > { %2141 = vrsqrt.f32 %v557_v31  ;;  %v554_v34 = vmul.f32 0.03125, %v546_v32  ;;  %v555_v35 = vmul.f32 0.03125, %v549_v33 }
 0x13b   : > { %v558_v36 = vadd.f32 1e-05, %v554_v34  ;;  %v559_v37 = vadd.f32 1e-05, %v555_v35 }
 0x13c   : > { %v552_v38 = vpop.xlane.xlu1 %551 }
 0x13d   : > { %2143 = vrsqrt.f32 %v558_v36  ;;  %v556_v39 = vmul.f32 0.03125, %v552_v38 }
 0x13e   : > { %2145 = vrsqrt.f32 %v559_v37 }
 0x13f   : > { %v560_v40 = vadd.f32 1e-05, %v556_v39 }
 0x141   : > { %2147 = vrsqrt.f32 %v560_v40 }
 0x143   : > { %v2142_v42 = vpop.eup %2141 }
 0x144   : > { %v565_v43 = vmul.f32 %v2142_v42, %v497_v41 }
 0x146   : > { %579 = vperm.xlu0 %2029, %v565_v43   ;;  %v569_v53 = vmul.f32 %v565_v43, %v529_v10 }
 0x147   : > { %v2144_v45 = vpop.eup %2143 }
 0x148   : > { %v566_v46 = vmul.f32 %v2144_v45, %v498_v44  ;;  %v2146_v47 = vpop.eup %2145  ;;  %v573_v55 = vsub.f32 %v501_v54, %v569_v53 }
 0x149   : > { %v567_v49 = vmul.f32 %v2146_v47, %v499_v48 }
 0x14a   : > { %584 = vperm.xlu1 %2030, %v566_v46   ;;  %v570_v56 = vmul.f32 %v566_v46, %v530_v16 }
 0x14b   : > { %v2148_v50 = vpop.eup %2147  ;;  %v571_v59 = vmul.f32 %v567_v49, %v2328_v11 }
 0x14c   : > { %v568_v52 = vmul.f32 %v2148_v50, %v500_v51  ;;  %v574_v58 = vsub.f32 %v502_v57, %v570_v56 }
 0x14d   : > { %v575_v61 = vsub.f32 %v503_v60, %v571_v59 }
 0x14e   : > { %589 = vperm.xlu1 %2030, %v567_v49   ;;  %v572_v62 = vmul.f32 %v568_v52, %v532_v17 }
 0x150   : > { %v576_v3 = vsub.f32 %v504_v63, %v572_v62 }
 0x152   : > { %594 = vperm.xlu1 %2030, %v568_v52  }
 0x156   : > { %603 = vperm.xlu1 %2030, %v573_v55  }
 0x15a   : > { %608 = vperm.xlu1 %2030, %v574_v58  }
 0x15e   : > { %613 = vperm.xlu1 %2030, %v575_v61  }
 0x162   : > { %618 = vperm.xlu1 %2030, %v576_v3  }
 0x1c5   : > { %v580_v8 = vpop.permute.xlu0 %579 }
 0x1c6   : > { %v597_v10 = vmul.f32 %v580_v8, %v2312_v0 }
 0x1c9   : > { %v585_v6 = vpop.permute.xlu1 %584 }
 0x1ca   : > { %v598_v13 = vmul.f32 %v585_v6, %v2316_v2 }
 0x1cd   : > { %v590_v7 = vpop.permute.xlu1 %589 }
 0x1ce   : > { %v599_v20 = vmul.f32 %v590_v7, %v2314_v1 }
 0x1d1   : > { %v595_v9 = vpop.permute.xlu1 %594 }
 0x1d2   : > { %v600_v2 = vmul.f32 %v595_v9, %v2322_v5 }
 0x1d5   : > { %v604_v11 = vpop.permute.xlu1 %603 }
 0x1d6   : > { %v2376_v12 = vadd.f32 %v604_v11, %v597_v10 }
 0x1d8   : > { %v2380_v14 = vmul.f32 0.70710677, %v2376_v12 }
 0x1d9   : > { %v609_v15 = vpop.permute.xlu1 %608 }
 0x1da   : > { %v641_v16 = vand.u32 2147483647, %v2380_v14  ;;  %v2383_v17 = vadd.f32 %v609_v15, %v598_v13  ;;  %vm633_vm3 = vcmp.ge.f32.partialorder %v2380_v14, 0.0  ;;  %v625_v14 = vmul.f32 0.5, %v2376_v12 }
 0x1dc   : > { %v645_v18 = vmul.f32 0.3275911, %v641_v16  ;;  %v2386_v19 = vmul.f32 0.70710677, %v2383_v17  ;;  %v697_v31 = vsub.f32 0.0, %v641_v16 }
 0x1dd   : > { %v614_v0 = vpop.permute.xlu1 %613 }
 0x1de   : > { %v649_v21 = vadd.f32 1.0, %v645_v18  ;;  %v642_v22 = vand.u32 2147483647, %v2386_v19  ;;  %v2390_v23 = vadd.f32 %v614_v0, %v599_v20  ;;  %v701_v35 = vmul.f32 %v697_v31, %v641_v16 }
 0x1df   : > { %vm634_vm4 = vcmp.ge.f32.partialorder %v2386_v19, 0.0  ;;  %v626_v19 = vmul.f32 0.5, %v2383_v17 }
 0x1e0   : > { %2149 = vrcp.f32 %v649_v21  ;;  %v646_v24 = vmul.f32 0.3275911, %v642_v22  ;;  %v2394_v25 = vmul.f32 0.70710677, %v2390_v23  ;;  %v698_v36 = vsub.f32 0.0, %v642_v22 }
 0x1e1   : > { %v619_v26 = vpop.permute.xlu1 %618  ;;  %v705_v41 = vmul.f32 1.442695, %v701_v35  ;;  %v627_v17 = vmul.f32 0.5, %v2390_v23 }
 0x1e2   : > { %v650_v27 = vadd.f32 1.0, %v646_v24  ;;  %v2396_v28 = vadd.f32 %v619_v26, %v600_v2  ;;  %v643_v29 = vand.u32 2147483647, %v2394_v25  ;;  %v702_v42 = vmul.f32 %v698_v36, %v642_v22 }
 0x1e3   : > { %vm635_vm5 = vcmp.ge.f32.partialorder %v2394_v25, 0.0 }
 0x1e4   : > { %2151 = vrcp.f32 %v650_v27  ;;  %v647_v1 = vmul.f32 0.3275911, %v643_v29  ;;  %v2400_v30 = vmul.f32 0.70710677, %v2396_v28  ;;  %v699_v43 = vsub.f32 0.0, %v643_v29 }
 0x1e5   : > { %v707_v48 = vmul.f32 1.442695, %v702_v42  ;;  %v2205_v27 = vmov -1.0  }
 0x1e6   : > { %v651_v32 = vadd.f32 1.0, %v647_v1  ;;  %v644_v5 = vand.u32 2147483647, %v2400_v30  ;;  %v703_v50 = vmul.f32 %v699_v43, %v643_v29  ;;  %v637_v29 = vsel %vm633_vm3, 1.0, %v2205_v27 }
 0x1e7   : > { %vm636_vm6 = vcmp.ge.f32.partialorder %v2400_v30, 0.0 }
 0x1e8   : > { %2153 = vrcp.f32 %v651_v32  ;;  %v648_v33 = vmul.f32 0.3275911, %v644_v5  ;;  %v700_v51 = vsub.f32 0.0, %v644_v5  ;;  %v709_v59 = vmul.f32 1.442695, %v703_v50 }
 0x1ea   : > { %v2150_v34 = vpop.eup %2149  ;;  %v652_v37 = vadd.f32 1.0, %v648_v33  ;;  %v704_v60 = vmul.f32 %v700_v51, %v644_v5 }
 0x1eb   : > { %v661_v38 = vmul.f32 1.0614054, %v2150_v34 }
 0x1ec   : > { %2155 = vrcp.f32 %v652_v37  ;;  %v711_v10 = vmul.f32 1.442695, %v704_v60  ;;  %v638_v37 = vsel %vm634_vm4, 1.0, %v2205_v27 }
 0x1ed   : > { %v665_v39 = vadd.f32 -1.4531521, %v661_v38  ;;  %2157 = vpow2.f32 %v705_v41 }
 0x1ee   : > { %v2152_v40 = vpop.eup %2151  ;;  %2159 = vpow2.f32 %v707_v48 }
 0x1ef   : > { %v669_v44 = vmul.f32 %v2150_v34, %v665_v39  ;;  %v662_v45 = vmul.f32 1.0614054, %v2152_v40  ;;  %2161 = vpow2.f32 %v709_v59 }
 0x1f0   : > { %2163 = vpow2.f32 %v711_v10 }
 0x1f1   : > { %v673_v46 = vadd.f32 1.4214138, %v669_v44  ;;  %v666_v47 = vadd.f32 -1.4531521, %v662_v45 }
 0x1f2   : > { %v2154_v49 = vpop.eup %2153 }
 0x1f3   : > { %v677_v52 = vmul.f32 %v2150_v34, %v673_v46  ;;  %v670_v53 = vmul.f32 %v2152_v40, %v666_v47  ;;  %v663_v54 = vmul.f32 1.0614054, %v2154_v49  ;;  %v2207_v47 = vmov 0.0|0.0  }
 0x1f4   : > { %1923 = vmatprep.subr.bf16.mxu0 %v2207_v47 }
 0x1f5   : > { %v681_v55 = vadd.f32 -0.28449672, %v677_v52  ;;  %v674_v56 = vadd.f32 1.4214138, %v670_v53  ;;  %v667_v57 = vadd.f32 -1.4531521, %v663_v54 }
 0x1f6   : > { %v2156_v58 = vpop.eup %2155  ;;  %v640_v54 = vsel %vm636_vm6, 1.0, %v2205_v27  ;;  %vm1640_vm6 = vcmask 130048  }
 0x1f7   : > { %v685_v61 = vmul.f32 %v2150_v34, %v681_v55  ;;  %v678_v62 = vmul.f32 %v2152_v40, %v674_v56  ;;  %v671_v63 = vmul.f32 %v2154_v49, %v667_v57  ;;  %v664_v3 = vmul.f32 1.0614054, %v2156_v58  ;;  %v2158_v15 = vpop.eup %2157 }
 0x1f8   : > { %v2160_v26 = vpop.eup %2159  ;;  %v628_v57 = vmul.f32 0.5, %v2396_v28  ;;  %v508_v28 = vld [vmem:[%s2647_s4] sm:$0xff] }
 0x1f9   : > { %v689_v6 = vadd.f32 0.2548296, %v685_v61  ;;  %v682_v7 = vadd.f32 -0.28449672, %v678_v62  ;;  %v675_v8 = vadd.f32 1.4214138, %v671_v63 }
 0x1fa   : > { %v668_v9 = vadd.f32 -1.4531521, %v664_v3 }
 0x1fb   : > { %v693_v11 = vmul.f32 %v2150_v34, %v689_v6  ;;  %v686_v13 = vmul.f32 %v2152_v40, %v682_v7  ;;  %v679_v16 = vmul.f32 %v2154_v49, %v675_v8 }
 0x1fc   : > { %v672_v18 = vmul.f32 %v2156_v58, %v668_v9 }
 0x1fd   : > { %v713_v20 = vmul.f32 %v2158_v15, %v693_v11  ;;  %v690_v0 = vadd.f32 0.2548296, %v686_v13  ;;  %v683_v21 = vadd.f32 -0.28449672, %v679_v16  ;;  %v510_v11 = vld [vmem:[%s2647_s4 + $0x10] sm:$0xff]  ;;  %v509_v13 = vld [vmem:[%s2647_s4 + $0x8] sm:$0xff] }
 0x1fe   : > { %v676_v22 = vadd.f32 1.4214138, %v672_v18 }
 0x1ff   : > { %v717_v2 = vsub.f32 1.0, %v713_v20  ;;  %v694_v24 = vmul.f32 %v2152_v40, %v690_v0  ;;  %v687_v1 = vmul.f32 %v2154_v49, %v683_v21  ;;  %v2162_v40 = vpop.eup %2161 }
 0x200   : > { %v680_v31 = vmul.f32 %v2156_v58, %v676_v22  ;;  %v2164_v48 = vpop.eup %2163 }
 0x201   : > { %v721_v32 = vmul.f32 %v717_v2, %v637_v29  ;;  %v714_v5 = vmul.f32 %v2160_v26, %v694_v24  ;;  %v691_v33 = vadd.f32 0.2548296, %v687_v1 }
 0x202   : > { %v684_v34 = vadd.f32 -0.28449672, %v680_v31 }
 0x203   : > { %v725_v35 = vadd.f32 1.0, %v721_v32  ;;  %v718_v36 = vsub.f32 1.0, %v714_v5  ;;  %v695_v38 = vmul.f32 %v2154_v49, %v691_v33  ;;  %v639_v49 = vsel %vm635_vm5, 1.0, %v2205_v27  ;;  %v511_v33 = vld [vmem:[%s2648_s5] sm:$0xff] }
 0x204   : > { %v688_v39 = vmul.f32 %v2156_v58, %v684_v34  ;;  %v512_v34 = vld [vmem:[%s2648_s5 + $0x8] sm:$0xff]  ;;  %vm1518_vm5 = vcmask 1047584  }
 0x205   : > { %v729_v41 = vmul.f32 %v725_v35, %v625_v14  ;;  %v722_v42 = vmul.f32 %v718_v36, %v638_v37  ;;  %v715_v43 = vmul.f32 %v2162_v40, %v695_v38  ;;  %v505_v35 = vld [vmem:[%s2646_s3] sm:$0xff]  ;;  %v1942_v36 = vpack.c.bf16 %v512_v34, %v511_v33  ;;  %v513_v37 = vld [vmem:[%s2648_s5 + $0x10] sm:$0xff]  ;;  %v514_v38 = vld [vmem:[%s2648_s5 + $0x18] sm:$0xff] }
 0x206   : > { %v692_v44 = vadd.f32 0.2548296, %v688_v39  ;;  %v506_v39 = vld [vmem:[%s2646_s3 + $0x8] sm:$0xff]  ;;  %v1945_v40 = vpack.c.bf16 %v514_v38, %v513_v37 }
 0x207   : > { %747 = vrot.lane.b32.xlu1 %v729_v41, %s2206_s27  ;;  %v726_v45 = vadd.f32 1.0, %v722_v42  ;;  %v719_v12 = vsub.f32 1.0, %v715_v43  ;;  %v507_v41 = vld [vmem:[%s2646_s3 + $0x10] sm:$0xff] }
 0x208   : > { %v696_v46 = vmul.f32 %v2156_v58, %v692_v44 }
 0x209   : > { %v730_v50 = vmul.f32 %v726_v45, %v626_v19  ;;  %v723_v25 = vmul.f32 %v719_v12, %v639_v49 }
 0x20a   : > { %v716_v51 = vmul.f32 %v2164_v48, %v696_v46 }
 0x20b   : > { %749 = vrot.lane.b32.xlu0 %v730_v50, %s2206_s27  ;;  %v727_v52 = vadd.f32 1.0, %v723_v25 }
 0x20c   : > { %v720_v53 = vsub.f32 1.0, %v716_v51 }
 0x20d   : > { %v731_v55 = vmul.f32 %v727_v52, %v627_v17 }
 0x20e   : > { %v724_v56 = vmul.f32 %v720_v53, %v640_v54 }
 0x20f   : > { %751 = vrot.lane.b32.xlu1 %v731_v55, %s2206_s27 }
 0x210   : > { %v728_v58 = vadd.f32 1.0, %v724_v56 }
 0x212   : > { %v732_v59 = vmul.f32 %v728_v58, %v628_v57 }
 0x214   : > { %753 = vrot.lane.b32.xlu0 %v732_v59, %s2206_s27 }
 0x279   : > { %v748_v30 = vpop.permute.xlu1 %747 }
 0x27a   : > { %760 = vst.msk [vmem:[#allocation2] sm:$0xff] %vm759_vm7, %v748_v30 }
 0x27d   : > { %v750_v60 = vpop.permute.xlu0 %749 }
 0x27e   : > { %761 = vst.msk [vmem:[#allocation2 + $0x8] sm:$0xff] %vm759_vm7, %v750_v60 }
 0x281   : > { %v752_v23 = vpop.permute.xlu1 %751  ;;  %v764_v61 = vld [vmem:[#allocation2] sm:$0xff] }
 0x282   : > { %762 = vst.msk [vmem:[#allocation2 + $0x10] sm:$0xff] %vm759_vm7, %v752_v23 }
 0x285   : > { %v765_v62 = vld [vmem:[#allocation2 + $0x8] sm:$0xff] }
 0x286   : > { %v754_v63 = vpop.permute.xlu0 %753  ;;  %v2031_v3 = vpack.i.bf16 %v765_v62, %v764_v61  ;;  %v1924_v6 = vpack.c.bf16 %v765_v62, %v764_v61 }
 0x287   : > { %763 = vst.msk [vmem:[#allocation2 + $0x18] sm:$0xff] %vm759_vm7, %v754_v63  ;;  %vm1539_vm7 = vcmask 1039360  }
 0x288   : > { %2032 = vrot.lane.b32.xlu1 %v2031_v3, %s2208_s28  ;;  %1925 = vmatpush3.bf16.msra.mxu0 %v1924_v6 }
 0x289   : > { %1926 = vmatprep.subr.bf16.mxu0 %v2207_v47  ;;  %v766_v7 = vld [vmem:[#allocation2 + $0x10] sm:$0xff] }
 0x28c   : > { %2042 = vrot.lane.b32.xlu1 %v2031_v3, %s2209_s29 }
 0x28e   : > { %v767_v8 = vld [vmem:[#allocation2 + $0x18] sm:$0xff] }
 0x28f   : > { %v2036_v9 = vpack.i.bf16 %v767_v8, %v766_v7  ;;  %v1927_v10 = vpack.c.bf16 %v767_v8, %v766_v7 }
 0x290   : > { %798 = vperm.xlu1 %2030, %v508_v28  }
 0x291   : > { %2037 = vrot.lane.b32.xlu0 %v2036_v9, %s2208_s28  ;;  %1928 = vmatpush3.bf16.msra.mxu0 %v1927_v10 }
 0x292   : > { %1929 = vmatprep.subr.bf16.mxu0 %v2207_v47 }
 0x294   : > { %808 = vperm.xlu1 %2030, %v510_v11  }
 0x295   : > { %2047 = vrot.lane.b32.xlu0 %v2036_v9, %s2209_s29 }
 0x299   : > { %803 = vperm.xlu0 %2029, %v509_v13  }
 0x2fa   : > { %v2033_v15 = vpop.permute.xlu1 %2032 }
 0x2fb   : > { %v2035_v16 = vunpack.i.h.bf16 %v2033_v15  ;;  %v2034_v18 = vunpack.i.l.bf16 %v2033_v15 }
 0x2fd   : > { %v1930_v20 = vpack.c.bf16 %v2035_v16, %v2034_v18 }
 0x2fe   : > { %v2043_v0 = vpop.permute.xlu1 %2042 }
 0x2ff   : > { %1931 = vmatpush3.bf16.msra.mxu0 %v1930_v20  ;;  %v2045_v24 = vunpack.i.h.bf16 %v2043_v0  ;;  %v2044_v26 = vunpack.i.l.bf16 %v2043_v0 }
 0x300   : > { %1932 = vmatprep.subr.bf16.mxu0 %v2207_v47 }
 0x301   : > { %v1936_v31 = vpack.c.bf16 %v2045_v24, %v2044_v26  ;;  %v990_v26 = vld [vmem:[%s2649_s6] sm:$0xff] }
 0x303   : > { %v2038_v21 = vpop.permute.xlu0 %2037 }
 0x304   : > { %v2040_v22 = vunpack.i.h.bf16 %v2038_v21  ;;  %v2039_v2 = vunpack.i.l.bf16 %v2038_v21 }
 0x306   : > { %v1933_v29 = vpack.c.bf16 %v2040_v22, %v2039_v2 }
 0x307   : > { %v2048_v1 = vpop.permute.xlu0 %2047 }
 0x308   : > { %1934 = vmatpush3.bf16.msra.mxu0 %v1933_v29  ;;  %v2050_v32 = vunpack.i.h.bf16 %v2048_v1  ;;  %v2049_v5 = vunpack.i.l.bf16 %v2048_v1 }
 0x309   : > { %1935 = vmatprep.subr.bf16.mxu0 %v2207_v47 }
 0x30a   : > { %v1939_v14 = vpack.c.bf16 %v2050_v32, %v2049_v5  ;;  %v993_v32 = vld [vmem:[%s2650_s7] sm:$0xff] }
 0x30c   : > { %1937 = vmatpush3.bf16.msra.mxu0 %v1936_v31  ;;  %v991_v31 = vld [vmem:[%s2649_s6 + $0x8] sm:$0xff] }
 0x30d   : > { %1938 = vmatprep.subr.bf16.mxu0 %v2207_v47 }
 0x30f   : > { %v799_v42 = vpop.permute.xlu1 %798 }
 0x310   : > { %1940 = vmatpush3.bf16.msra.mxu0 %v1939_v14 }
 0x311   : > { %1941 = vmatprep.subr.bf16.mxu0 %v2207_v47 }
 0x313   : > { %1858 = vmatmul.mubr.msk.f32.vlgmr.msra.gmra.mrb[0].mxu0 %vm811_vm9, %v505_v35  ;;  %v809_v49 = vpop.permute.xlu1 %808  ;;  %v994_v35 = vld [vmem:[%s2650_s7 + $0x8] sm:$0xff] }
 0x314   : > { %1860 = vmatprep.mubr.msk.f32.mxu0 %vm2210_vm8, %v2204_v4  ;;  %1943 = vmatpush3.bf16.msra.mxu0 %v1942_v36  ;;  %v992_v36 = vld [vmem:[%s2649_s6 + $0x10] sm:$0xff] }
 0x315   : > { %1944 = vmatprep.subr.bf16.mxu0 %v2207_v47 }
 0x317   : > { %1861 = vmatmul.mubr.msk.f32.gmra.mrb[2].mxu0 %vm811_vm9, %v506_v39 }
 0x318   : > { %1863 = vmatprep.mubr.msk.f32.mxu0 %vm2210_vm8, %v2204_v4  ;;  %1946 = vmatpush3.bf16.msra.mxu0 %v1945_v40  ;;  %v804_v45 = vpop.permute.xlu0 %803 }
 0x31b   : > { %1864 = vmatmul.mubr.msk.f32.gmra.mrb[4].mxu0 %vm811_vm9, %v507_v41  ;;  %v995_v41 = vld [vmem:[%s2650_s7 + $0x10] sm:$0xff]  ;;  %vm1565_vm9 = vcmask 1022976  }
 0x31c   : > { %1874 = vmatprep.mubr.msk.f32.mxu0 %vm2210_vm8, %v2204_v4 }
 0x3e6   : > { %v887_v43 = vpop.f32.mrb[0].mxu0 }
 0x3e7   : > { %v888_v44 = vadd.f32 %v887_v43, %v799_v42  ;;  %v1859_v19 = vpop.f32.mrb[1].mxu0 }
 0x3e9   : > { %1875 = vmatmul.mubr.msk.f32.vlgmr.msra.gmra.mrb[6].mxu0 %vm515_vm0, %v888_v44 }
 0x3ea   : > { %v892_v12 = vpop.f32.mrb[2].mxu0  ;;  %1877 = vmatprep.mubr.msk.f32.mxu0 %vm2210_vm8, %v2204_v4 }
 0x3eb   : > { %v893_v46 = vadd.f32 %v892_v12, %v804_v45  ;;  %v1862_v48 = vpop.f32.mrb[3].mxu0 }
 0x3ed   : > { %1878 = vmatmul.mubr.msk.f32.gmra.mrb[8].mxu0 %vm515_vm0, %v893_v46 }
 0x3ee   : > { %v897_v50 = vpop.f32.mrb[4].mxu0  ;;  %1880 = vmatprep.mubr.msk.f32.mxu0 %vm2210_vm8, %v2204_v4  ;;  %vm1552_vm8 = vcmask 1031168  }
 0x3ef   : > { %v898_v25 = vadd.f32 %v897_v50, %v809_v49  ;;  %v1865_v51 = vpop.f32.mrb[5].mxu0 }
 0x3f1   : > { %1881 = vmatmul.mubr.msk.f32.gmra.mrb[10].mxu0 %vm515_vm0, %v898_v25  ;;  %vm1229_vm0 = vcmask 588800  }
 0x4bc   : > { %v2476_v17 = vpop.f32.mrb[6].mxu0 }
 0x4bd   : > { %v1876_v52 = vpop.f32.mrb[7].mxu0  ;;  %v1009_v53 = vsel %vm1008_vm10, %v2476_v17, 0.0 }
 0x4be   : > { %1010 = vadd.xlane.f32.xlu0 %v1009_v53 }
 0x4c0   : > { %v2480_v54 = vpop.f32.mrb[8].mxu0 }
 0x4c1   : > { %v1879_v55 = vpop.f32.mrb[9].mxu0  ;;  %v1012_v56 = vsel %vm1008_vm10, %v2480_v54, 0.0 }
 0x4c2   : > { %1013 = vadd.xlane.f32.xlu1 %v1012_v56 }
 0x4c4   : > { %v2484_v57 = vpop.f32.mrb[10].mxu0 }
 0x4c5   : > { %v1882_v58 = vpop.f32.mrb[11].mxu0  ;;  %v1015_v59 = vsel %vm1008_vm10, %v2484_v57, 0.0 }
 0x4c6   : > { %1016 = vadd.xlane.f32.xlu0 %v1015_v59 }
 0x54b   : > { %v1011_v30 = vpop.xlane.xlu0 %1010 }
 0x54c   : > { %v1019_v60 = vmul.f32 0.015625, %v1011_v30 }
 0x54e   : > { %v1022_v23 = vsub.f32 %v2476_v17, %v1019_v60 }
 0x54f   : > { %v1014_v61 = vpop.xlane.xlu1 %1013 }
 0x550   : > { %v1020_v62 = vmul.f32 0.015625, %v1014_v61  ;;  %v1025_v63 = vmul.f32 %v1022_v23, %v1022_v23 }
 0x552   : > { %v1023_v3 = vsub.f32 %v2480_v54, %v1020_v62  ;;  %v1028_v6 = vsel %vm1008_vm10, %v1025_v63, 0.0 }
 0x553   : > { %1029 = vadd.xlane.f32.xlu0 %v1028_v6  ;;  %v1017_v28 = vpop.xlane.xlu0 %1016 }
 0x554   : > { %v1021_v7 = vmul.f32 0.015625, %v1017_v28  ;;  %v1026_v8 = vmul.f32 %v1023_v3, %v1023_v3 }
 0x556   : > { %v1024_v9 = vsub.f32 %v2484_v57, %v1021_v7  ;;  %v1031_v10 = vsel %vm1008_vm10, %v1026_v8, 0.0 }
 0x557   : > { %1032 = vadd.xlane.f32.xlu1 %v1031_v10 }
 0x558   : > { %v1027_v11 = vmul.f32 %v1024_v9, %v1024_v9 }
 0x55a   : > { %v1034_v13 = vsel %vm1008_vm10, %v1027_v11, 0.0 }
 0x55b   : > { %1035 = vadd.xlane.f32.xlu0 %v1034_v13 }
 0x5e0   : > { %v1030_v15 = vpop.xlane.xlu0 %1029 }
 0x5e1   : > { %v1037_v16 = vmul.f32 0.015625, %v1030_v15 }
 0x5e3   : > { %v1040_v18 = vadd.f32 1e-05, %v1037_v16 }
 0x5e4   : > { %v1033_v20 = vpop.xlane.xlu1 %1032 }
 0x5e5   : > { %2165 = vrsqrt.f32 %v1040_v18  ;;  %v1038_v0 = vmul.f32 0.015625, %v1033_v20 }
 0x5e7   : > { %v1041_v21 = vadd.f32 1e-05, %v1038_v0 }
 0x5e8   : > { %v1036_v22 = vpop.xlane.xlu0 %1035 }
 0x5e9   : > { %2167 = vrsqrt.f32 %v1041_v21  ;;  %v1039_v2 = vmul.f32 0.015625, %v1036_v22 }
 0x5eb   : > { %v1042_v24 = vadd.f32 1e-05, %v1039_v2 }
 0x5ed   : > { %2169 = vrsqrt.f32 %v1042_v24 }
 0x5ef   : > { %v2166_v29 = vpop.eup %2165 }
 0x5f0   : > { %v1046_v1 = vmul.f32 %v2166_v29, %v990_v26 }
 0x5f2   : > { %1057 = vperm.xlu1 %2030, %v1046_v1   ;;  %v1049_v5 = vmul.f32 %v1046_v1, %v1019_v60 }
 0x5f3   : > { %v2168_v33 = vpop.eup %2167 }
 0x5f4   : > { %v1047_v34 = vmul.f32 %v2168_v33, %v991_v31  ;;  %v1052_v14 = vsub.f32 %v993_v32, %v1049_v5 }
 0x5f6   : > { %1062 = vperm.xlu1 %2030, %v1047_v34   ;;  %1075 = vperm.xlu0 %2029, %v1052_v14   ;;  %v1050_v37 = vmul.f32 %v1047_v34, %v1020_v62 }
 0x5f7   : > { %v2170_v38 = vpop.eup %2169 }
 0x5f8   : > { %v1053_v39 = vsub.f32 %v994_v35, %v1050_v37  ;;  %v1048_v40 = vmul.f32 %v2170_v38, %v992_v36 }
 0x5fa   : > { %1080 = vperm.xlu0 %2029, %v1053_v39   ;;  %1067 = vperm.xlu1 %2030, %v1048_v40   ;;  %v1051_v42 = vmul.f32 %v1048_v40, %v1021_v7 }
 0x5fc   : > { %v1054_v43 = vsub.f32 %v995_v41, %v1051_v42 }
 0x5fe   : > { %1085 = vperm.xlu1 %2030, %v1054_v43  }
 0x671   : > { %v1058_v44 = vpop.permute.xlu1 %1057 }
 0x672   : > { %v1070_v19 = vmul.f32 %v1058_v44, %v2476_v17 }
 0x675   : > { %v1063_v45 = vpop.permute.xlu1 %1062  ;;  %v1076_v12 = vpop.permute.xlu0 %1075 }
 0x676   : > { %v2516_v46 = vadd.f32 %v1076_v12, %v1070_v19  ;;  %v1071_v48 = vmul.f32 %v1063_v45, %v2480_v54 }
 0x678   : > { %v2520_v49 = vmul.f32 0.70710677, %v2516_v46 }
 0x679   : > { %v1068_v50 = vpop.permute.xlu1 %1067  ;;  %v1081_v25 = vpop.permute.xlu0 %1080 }
 0x67a   : > { %v1103_v51 = vand.u32 2147483647, %v2520_v49  ;;  %v2523_v52 = vadd.f32 %v1081_v25, %v1071_v48  ;;  %v1072_v17 = vmul.f32 %v1068_v50, %v2484_v57  ;;  %vm1097_vm12 = vcmp.ge.f32.partialorder %v2520_v49, 0.0 }
 0x67b   : > { %v1100_v12 = vsel %vm1097_vm12, 1.0, %v2205_v27  ;;  %vm1604_vm12 = vcmask 998400  }
 0x67c   : > { %v1106_v53 = vmul.f32 0.3275911, %v1103_v51  ;;  %v2526_v55 = vmul.f32 0.70710677, %v2523_v52  ;;  %v1145_v63 = vsub.f32 0.0, %v1103_v51 }
 0x67d   : > { %v1086_v56 = vpop.permute.xlu1 %1085 }
 0x67e   : > { %v1109_v58 = vadd.f32 1.0, %v1106_v53  ;;  %v1104_v59 = vand.u32 2147483647, %v2526_v55  ;;  %v2530_v54 = vadd.f32 %v1086_v56, %v1072_v17  ;;  %v1148_v6 = vmul.f32 %v1145_v63, %v1103_v51 }
 0x67f   : > { %vm1098_vm13 = vcmp.ge.f32.partialorder %v2526_v55, 0.0  ;;  %v1091_v53 = vmul.f32 0.5, %v2516_v46 }
 0x680   : > { %2171 = vrcp.f32 %v1109_v58  ;;  %v1107_v30 = vmul.f32 0.3275911, %v1104_v59  ;;  %v2533_v60 = vmul.f32 0.70710677, %v2530_v54  ;;  %v1146_v28 = vsub.f32 0.0, %v1104_v59 }
 0x681   : > { %v1151_v10 = vmul.f32 1.442695, %v1148_v6  ;;  %v1101_v49 = vsel %vm1098_vm13, 1.0, %v2205_v27  ;;  %v1093_v6 = vmul.f32 0.5, %v2530_v54  ;;  %v998_v54 = vld [vmem:[%s2652_s9] sm:$0xff]  ;;  %vm1617_vm13 = vcmask 990208  }
 0x682   : > { %v1110_v23 = vadd.f32 1.0, %v1107_v30  ;;  %v1105_v61 = vand.u32 2147483647, %v2533_v60  ;;  %v1149_v11 = vmul.f32 %v1146_v28, %v1104_v59  ;;  %vm1099_vm14 = vcmp.ge.f32.partialorder %v2533_v60, 0.0 }
 0x684   : > { %2173 = vrcp.f32 %v1110_v23  ;;  %v1108_v62 = vmul.f32 0.3275911, %v1105_v61  ;;  %v1147_v13 = vsub.f32 0.0, %v1105_v61  ;;  %v1153_v0 = vmul.f32 1.442695, %v1149_v11 }
 0x686   : > { %v1111_v3 = vadd.f32 1.0, %v1108_v62  ;;  %v1150_v22 = vmul.f32 %v1147_v13, %v1105_v61  ;;  %v1092_v62 = vmul.f32 0.5, %v2523_v52 }
 0x688   : > { %2175 = vrcp.f32 %v1111_v3  ;;  %v1155_v32 = vmul.f32 1.442695, %v1150_v22  ;;  %v1102_v3 = vsel %vm1099_vm14, 1.0, %v2205_v27  ;;  %v1002_v22 = vld [vmem:[%s2653_s10 + $0x10] sm:$0xff]  ;;  %vm1630_vm14 = vcmask 982016  }
 0x689   : > { %2177 = vpow2.f32 %v1151_v10 }
 0x68a   : > { %v2172_v57 = vpop.eup %2171  ;;  %2179 = vpow2.f32 %v1153_v0  ;;  %v1000_v0 = vld [vmem:[%s2653_s10] sm:$0xff] }
 0x68b   : > { %v1118_v7 = vmul.f32 1.0614054, %v2172_v57  ;;  %2181 = vpow2.f32 %v1155_v32 }
 0x68d   : > { %v1121_v8 = vadd.f32 -1.4531521, %v1118_v7 }
 0x68e   : > { %v2174_v9 = vpop.eup %2173 }
 0x68f   : > { %v1124_v15 = vmul.f32 %v2172_v57, %v1121_v8  ;;  %v1119_v16 = vmul.f32 1.0614054, %v2174_v9 }
 0x691   : > { %v1127_v18 = vadd.f32 1.4214138, %v1124_v15  ;;  %v1122_v20 = vadd.f32 -1.4531521, %v1119_v16 }
 0x692   : > { %v2176_v21 = vpop.eup %2175 }
 0x693   : > { %v1130_v2 = vmul.f32 %v2172_v57, %v1127_v18  ;;  %v1125_v24 = vmul.f32 %v2174_v9, %v1122_v20  ;;  %v1120_v26 = vmul.f32 1.0614054, %v2176_v21  ;;  %v2178_v39 = vpop.eup %2177  ;;  %v996_v18 = vld [vmem:[%s2651_s8] sm:$0xff]  ;;  %v999_v20 = vld [vmem:[%s2652_s9 + $0x8] sm:$0xff] }
 0x694   : > { %v2180_v45 = vpop.eup %2179  ;;  %1901 = vmatprep.mubr.msk.f32.mxu1 %vm1229_vm0, %v996_v18 }
 0x695   : > { %v1133_v29 = vadd.f32 -0.28449672, %v1130_v2  ;;  %v1128_v1 = vadd.f32 1.4214138, %v1125_v24  ;;  %v1123_v31 = vadd.f32 -1.4531521, %v1120_v26  ;;  %v2182_v59 = vpop.eup %2181 }
 0x696   : > { %v1003_v24 = vld [vmem:[%s2653_s10 + $0x18] sm:$0xff] }
 0x697   : > { %v1136_v5 = vmul.f32 %v2172_v57, %v1133_v29  ;;  %v1131_v33 = vmul.f32 %v2174_v9, %v1128_v1  ;;  %v1126_v34 = vmul.f32 %v2176_v21, %v1123_v31  ;;  %v1967_v26 = vpack.c.bf16 %v1003_v24, %v1002_v22  ;;  %v1004_v29 = vld [vmem:[%s2653_s10 + $0x20] sm:$0xff]  ;;  %v1005_v1 = vld [vmem:[%s2653_s10 + $0x28] sm:$0xff] }
 0x698   : > { %v1971_v31 = vpack.c.bf16 %v1005_v1, %v1004_v29 }
 0x699   : > { %v1139_v14 = vadd.f32 0.2548296, %v1136_v5  ;;  %v1134_v35 = vadd.f32 -0.28449672, %v1131_v33  ;;  %v1129_v36 = vadd.f32 1.4214138, %v1126_v34 }
 0x69b   : > { %v1142_v37 = vmul.f32 %v2172_v57, %v1139_v14  ;;  %v1137_v38 = vmul.f32 %v2174_v9, %v1134_v35  ;;  %v1132_v40 = vmul.f32 %v2176_v21, %v1129_v36 }
 0x69d   : > { %v1157_v41 = vmul.f32 %v2178_v39, %v1142_v37  ;;  %v1140_v42 = vadd.f32 0.2548296, %v1137_v38  ;;  %v1135_v43 = vadd.f32 -0.28449672, %v1132_v40 }
 0x69f   : > { %v1160_v44 = vsub.f32 1.0, %v1157_v41  ;;  %v1143_v19 = vmul.f32 %v2174_v9, %v1140_v42  ;;  %v1138_v48 = vmul.f32 %v2176_v21, %v1135_v43  ;;  %v997_v41 = vld [vmem:[%s2651_s8 + $0x8] sm:$0xff]  ;;  %v1006_v42 = vld [vmem:[%s2653_s10 + $0x30] sm:$0xff]  ;;  %v1007_v43 = vld [vmem:[%s2653_s10 + $0x38] sm:$0xff] }
 0x6a1   : > { %v1163_v50 = vmul.f32 %v1160_v44, %v1100_v12  ;;  %v1158_v25 = vmul.f32 %v2180_v45, %v1143_v19  ;;  %v1141_v51 = vadd.f32 0.2548296, %v1138_v48  ;;  %v1975_v44 = vpack.c.bf16 %v1007_v43, %v1006_v42 }
 0x6a3   : > { %v1166_v17 = vadd.f32 1.0, %v1163_v50  ;;  %v1161_v56 = vsub.f32 1.0, %v1158_v25  ;;  %v1144_v58 = vmul.f32 %v2176_v21, %v1141_v51  ;;  %v1001_v21 = vld [vmem:[%s2653_s10 + $0x8] sm:$0xff] }
 0x6a4   : > { %v1963_v2 = vpack.c.bf16 %v1001_v21, %v1000_v0 }
 0x6a5   : > { %v1169_v30 = vmul.f32 %v1166_v17, %v1091_v53  ;;  %v1164_v23 = vmul.f32 %v1161_v56, %v1101_v49  ;;  %v1159_v61 = vmul.f32 %v2182_v59, %v1144_v58 }
 0x6a6   : > { %1964 = vmatprep.subr.bf16.mxu0 %v1963_v2 }
 0x6a7   : > { %1182 = vrot.lane.b32.xlu0 %v1169_v30, %s2206_s27  ;;  %v1167_v55 = vadd.f32 1.0, %v1164_v23  ;;  %v1162_v63 = vsub.f32 1.0, %v1159_v61  ;;  %1966 = vmatpush3.bf16.msra.mxu0 %v1963_v2 }
 0x6a8   : > { %1968 = vmatprep.subr.bf16.mxu0 %v1967_v26 }
 0x6a9   : > { %v1170_v46 = vmul.f32 %v1167_v55, %v1092_v62  ;;  %v1165_v57 = vmul.f32 %v1162_v63, %v1102_v3 }
 0x6ab   : > { %1184 = vrot.lane.b32.xlu1 %v1170_v46, %s2206_s27  ;;  %v1168_v28 = vadd.f32 1.0, %v1165_v57  ;;  %1970 = vmatpush3.bf16.msra.mxu0 %v1967_v26 }
 0x6ac   : > { %1972 = vmatprep.subr.bf16.mxu0 %v1971_v31 }
 0x6ad   : > { %v1171_v7 = vmul.f32 %v1168_v28, %v1093_v6  ;;  %v1393_v6 = vld [vmem:[%s2654_s11 + $0x8] sm:$0xff]  ;;  %v1392_v28 = vld [vmem:[%s2654_s11] sm:$0xff] }
 0x6af   : > { %1186 = vrot.lane.b32.xlu0 %v1171_v7, %s2206_s27  ;;  %1974 = vmatpush3.bf16.msra.mxu0 %v1971_v31  ;;  %s2214_s27 = smov 123  }
 0x6b0   : > { %1976 = vmatprep.subr.bf16.mxu0 %v1975_v44 }
 0x6b3   : > { %1978 = vmatpush3.bf16.msra.mxu0 %v1975_v44 }
 0x719   : > { %v1183_v60 = vpop.permute.xlu0 %1182 }
 0x71a   : > { %1192 = vst.msk [vmem:[#allocation3] sm:$0xff] %vm1191_vm15, %v1183_v60 }
 0x71d   : > { %v1185_v52 = vpop.permute.xlu1 %1184 }
 0x71e   : > { %1193 = vst.msk [vmem:[#allocation3 + $0x8] sm:$0xff] %vm1191_vm15, %v1185_v52 }
 0x721   : > { %v1195_v8 = vld [vmem:[#allocation3] sm:$0xff]  ;;  %v1187_v9 = vpop.permute.xlu0 %1186 }
 0x722   : > { %1201 = vrot.lane.b32.xlu1 %v1195_v8, %s2208_s28  ;;  %1194 = vst.msk [vmem:[#allocation3 + $0x10] sm:$0xff] %vm1191_vm15, %v1187_v9  ;;  %v1395_v9 = vld [vmem:[%s2655_s12 + $0x8] sm:$0xff] }
 0x725   : > { %v1196_v10 = vld [vmem:[#allocation3 + $0x8] sm:$0xff] }
 0x726   : > { %v2056_v11 = vpack.i.bf16 %v1196_v10, %v1195_v8  ;;  %v1947_v13 = vpack.c.bf16 %v1196_v10, %v1195_v8 }
 0x728   : > { %2057 = vrot.lane.b32.xlu1 %v2056_v11, %s2209_s29  ;;  %1948 = vmatprep.subr.bf16.mxu1 %v1947_v13 }
 0x729   : > { %1950 = vmatpush3.bf16.msra.mxu1 %v1947_v13  ;;  %v1197_v15 = vld [vmem:[#allocation3 + $0x10] sm:$0xff] }
 0x72a   : > { %v2051_v16 = vpack.i.bf16 %v1197_v15, %v1196_v10  ;;  %v1394_v10 = vld [vmem:[%s2655_s12] sm:$0xff] }
 0x72c   : > { %1221 = vperm.xlu1 %2030, %v998_v54   ;;  %2052 = vrot.lane.b32.xlu0 %v2051_v16, %s2208_s28 }
 0x730   : > { %1214 = vrot.lane.b32.xlu0 %v1197_v15, %s2209_s29 }
 0x734   : > { %1226 = vperm.xlu0 %2029, %v999_v20  }
 0x794   : > { %v1202_v32 = vpop.permute.xlu1 %1201 }
 0x795   : > { %v1951_v5 = vpack.c.bf16 %v1202_v32, %v1197_v15 }
 0x797   : > { %1952 = vmatprep.subr.bf16.mxu1 %v1951_v5 }
 0x798   : > { %1954 = vmatpush3.bf16.msra.mxu1 %v1951_v5 }
 0x79a   : > { %v2058_v33 = vpop.permute.xlu1 %2057 }
 0x79b   : > { %v2060_v14 = vunpack.i.h.bf16 %v2058_v33  ;;  %v2059_v35 = vunpack.i.l.bf16 %v2058_v33 }
 0x79d   : > { %v1959_v39 = vpack.c.bf16 %v2060_v14, %v2059_v35 }
 0x79e   : > { %v2053_v34 = vpop.permute.xlu0 %2052 }
 0x79f   : > { %v2055_v36 = vunpack.i.h.bf16 %v2053_v34  ;;  %v2054_v37 = vunpack.i.l.bf16 %v2053_v34 }
 0x7a1   : > { %v1955_v38 = vpack.c.bf16 %v2055_v36, %v2054_v37 }
 0x7a2   : > { %v1215_v40 = vpop.permute.xlu0 %1214 }
 0x7a3   : > { %1956 = vmatprep.subr.bf16.mxu1 %v1955_v38 }
 0x7a4   : > { %1958 = vmatpush3.bf16.msra.mxu1 %v1955_v38 }
 0x7a5   : > { %1960 = vmatprep.subr.bf16.mxu1 %v1959_v39 }
 0x7a8   : > { %1962 = vmatpush3.bf16.msra.mxu1 %v1959_v39 }
 0x7a9   : > { %1899 = vmatprep.subr.mxu1 %v1215_v40 }
 0x7ab   : > { %v1222_v45 = vpop.permute.xlu1 %1221 }
 0x7ac   : > { %1900 = vmatpush3.msra.mxu1 %v1215_v40 }
 0x7ad   : > { %1902 = vmatmul.mubr.msk.f32.vlgmr.msra.gmra.mrb[0].mxu1 %vm1229_vm0, %v997_v41  ;;  %1979 = vmatprep.subr.bf16.mxu1 %v2207_v47 }
 0x7b3   : > { %v1227_v48 = vpop.permute.xlu0 %1226 }
 0x880   : > { %v1903_v19 = vpop.f32.mrb[0].mxu1 }
 0x881   : > { %v1302_v12 = vpop.f32.mrb[1].mxu1  ;;  %v1308_v25 = vadd.f32 %v1903_v19, %v1227_v48 }
 0x882   : > { %v1303_v50 = vadd.f32 %v1302_v12, %v1222_v45 }
 0x884   : > { %1920 = vmatprep.mubr.msk.f32.mxu0 %vm1008_vm10, %v1303_v50 }
 0x885   : > { %1921 = vmatmul.mubr.msk.f32.vlgmr.msra.gmra.mrb[12].mxu0 %vm1008_vm10, %v1308_v25  ;;  %vm1578_vm10 = vcmask 1014784  }
 0x958   : > { %v1922_v51 = vpop.f32.mrb[12].mxu0 }
 0x959   : > { %1401 = vadd.xlane.f32.xlu0 %v1922_v51  ;;  %v1383_v53 = vpop.f32.mrb[13].mxu0 }
 0x95a   : > { %1399 = vadd.xlane.f32.xlu1 %v1383_v53 }
 0x9e6   : > { %v1402_v17 = vpop.xlane.xlu0 %1401 }
 0x9e7   : > { %v1405_v56 = vmul.f32 0.0078125, %v1402_v17  ;;  %v1400_v49 = vpop.xlane.xlu1 %1399 }
 0x9e8   : > { %v1404_v58 = vmul.f32 0.0078125, %v1400_v49 }
 0x9e9   : > { %v1407_v59 = vsub.f32 %v1922_v51, %v1405_v56 }
 0x9ea   : > { %v1406_v30 = vsub.f32 %v1383_v53, %v1404_v58 }
 0x9eb   : > { %v1409_v23 = vmul.f32 %v1407_v59, %v1407_v59 }
 0x9ec   : > { %v1408_v61 = vmul.f32 %v1406_v30, %v1406_v30 }
 0x9ed   : > { %1412 = vadd.xlane.f32.xlu1 %v1409_v23 }
 0x9ee   : > { %1410 = vadd.xlane.f32.xlu0 %v1408_v61 }
 0xa7a   : > { %v1413_v62 = vpop.xlane.xlu1 %1412 }
 0xa7b   : > { %v1415_v55 = vmul.f32 0.0078125, %v1413_v62  ;;  %v1411_v63 = vpop.xlane.xlu0 %1410 }
 0xa7c   : > { %v1414_v3 = vmul.f32 0.0078125, %v1411_v63 }
 0xa7d   : > { %v1417_v46 = vadd.f32 1e-05, %v1415_v55 }
 0xa7e   : > { %v1416_v57 = vadd.f32 1e-05, %v1414_v3 }
 0xa7f   : > { %2183 = vrsqrt.f32 %v1417_v46 }
 0xa80   : > { %2185 = vrsqrt.f32 %v1416_v57 }
 0xa89   : > { %v2184_v7 = vpop.eup %2183 }
 0xa8a   : > { %v2186_v60 = vpop.eup %2185  ;;  %v1421_v52 = vmul.f32 %v2184_v7, %v1393_v6 }
 0xa8b   : > { %v1420_v8 = vmul.f32 %v2186_v60, %v1392_v28 }
 0xa8c   : > { %1433 = vperm.xlu1 %2030, %v1421_v52   ;;  %v1423_v11 = vmul.f32 %v1421_v52, %v1405_v56 }
 0xa8d   : > { %1428 = vperm.xlu0 %2029, %v1420_v8   ;;  %v1422_v13 = vmul.f32 %v1420_v8, %v1404_v58 }
 0xa8e   : > { %v1425_v54 = vsub.f32 %v1395_v9, %v1423_v11 }
 0xa8f   : > { %v1424_v15 = vsub.f32 %v1394_v10, %v1422_v13 }
 0xa91   : > { %1440 = vperm.xlu1 %2030, %v1424_v15   ;;  %1445 = vperm.xlu0 %2029, %v1425_v54  }
 0xb0b   : > { %v1434_v16 = vpop.permute.xlu1 %1433 }
 0xb0c   : > { %v1429_v18 = vpop.permute.xlu0 %1428  ;;  %v1437_v20 = vmul.f32 %v1922_v51, %v1434_v16 }
 0xb0d   : > { %v1436_v0 = vmul.f32 %v1429_v18, %v1383_v53 }
 0xb10   : > { %v1441_v21 = vpop.permute.xlu1 %1440  ;;  %v1446_v22 = vpop.permute.xlu0 %1445 }
 0xb11   : > { %v1448_v2 = vadd.f32 %v1441_v21, %v1436_v0  ;;  %v1449_v24 = vadd.f32 %v1446_v22, %v1437_v20  ;;  %v1397_v21 = vld [vmem:[%s2656_s13 + $0x8] sm:$0x1f]  ;;  %v1398_v22 = vld [vmem:[%s2657_s14] sm:$0x1f] }
 0xb12   : > { %1786 = vmatprep.mubr.msk.f32.mxu1 %vm1640_vm6, %v1397_v21 }
 0xb13   : > { %v1452_v26 = vmul.f32 0.70710677, %v1448_v2  ;;  %v1453_v29 = vmul.f32 0.70710677, %v1449_v24  ;;  %v1450_v7 = vmul.f32 0.5, %v1448_v2  ;;  %v1451_v52 = vmul.f32 0.5, %v1449_v24 }
 0xb15   : > { %v1458_v1 = vand.u32 2147483647, %v1452_v26  ;;  %v1459_v31 = vand.u32 2147483647, %v1453_v29  ;;  %vm1454_vm3 = vcmp.ge.f32.partialorder %v1452_v26, 0.0  ;;  %vm1455_vm4 = vcmp.ge.f32.partialorder %v1453_v29, 0.0 }
 0xb16   : > { %v1456_v3 = vsel %vm1454_vm3, 1.0, %v2205_v27  ;;  %v1457_v57 = vsel %vm1455_vm4, 1.0, %v2205_v27 }
 0xb17   : > { %v1460_v32 = vmul.f32 0.3275911, %v1458_v1  ;;  %v1461_v5 = vmul.f32 0.3275911, %v1459_v31  ;;  %v1486_v14 = vsub.f32 0.0, %v1458_v1  ;;  %v1487_v4 = vsub.f32 0.0, %v1459_v31 }
 0xb19   : > { %v1462_v33 = vadd.f32 1.0, %v1460_v32  ;;  %v1463_v34 = vadd.f32 1.0, %v1461_v5  ;;  %v1488_v36 = vmul.f32 %v1486_v14, %v1458_v1  ;;  %v1489_v38 = vmul.f32 %v1487_v4, %v1459_v31 }
 0xb1b   : > { %2187 = vrcp.f32 %v1462_v33  ;;  %v1490_v42 = vmul.f32 1.442695, %v1488_v36  ;;  %v1492_v44 = vmul.f32 1.442695, %v1489_v38 }
 0xb1c   : > { %2189 = vrcp.f32 %v1463_v34 }
 0xb1d   : > { %2191 = vpow2.f32 %v1490_v42 }
 0xb1e   : > { %2193 = vpow2.f32 %v1492_v44 }
 0xb25   : > { %v2188_v35 = vpop.eup %2187 }
 0xb26   : > { %v2190_v37 = vpop.eup %2189  ;;  %v1468_v39 = vmul.f32 1.0614054, %v2188_v35 }
 0xb27   : > { %v1469_v40 = vmul.f32 1.0614054, %v2190_v37  ;;  %v2192_v30 = vpop.eup %2191 }
 0xb28   : > { %v1470_v41 = vadd.f32 -1.4531521, %v1468_v39  ;;  %v2194_v61 = vpop.eup %2193 }
 0xb29   : > { %v1471_v43 = vadd.f32 -1.4531521, %v1469_v40 }
 0xb2a   : > { %v1472_v19 = vmul.f32 %v2188_v35, %v1470_v41 }
 0xb2b   : > { %v1473_v45 = vmul.f32 %v2190_v37, %v1471_v43 }
 0xb2c   : > { %v1474_v12 = vadd.f32 1.4214138, %v1472_v19 }
 0xb2d   : > { %v1475_v48 = vadd.f32 1.4214138, %v1473_v45 }
 0xb2e   : > { %v1476_v50 = vmul.f32 %v2188_v35, %v1474_v12 }
 0xb2f   : > { %v1477_v25 = vmul.f32 %v2190_v37, %v1475_v48 }
 0xb30   : > { %v1478_v51 = vadd.f32 -0.28449672, %v1476_v50 }
 0xb31   : > { %v1479_v53 = vadd.f32 -0.28449672, %v1477_v25 }
 0xb32   : > { %v1480_v17 = vmul.f32 %v2188_v35, %v1478_v51 }
 0xb33   : > { %v1481_v56 = vmul.f32 %v2190_v37, %v1479_v53 }
 0xb34   : > { %v1482_v49 = vadd.f32 0.2548296, %v1480_v17 }
 0xb35   : > { %v1483_v58 = vadd.f32 0.2548296, %v1481_v56 }
 0xb36   : > { %v1484_v59 = vmul.f32 %v2188_v35, %v1482_v49 }
 0xb37   : > { %v1485_v23 = vmul.f32 %v2190_v37, %v1483_v58 }
 0xb38   : > { %v1494_v62 = vmul.f32 %v2192_v30, %v1484_v59 }
 0xb39   : > { %v1495_v55 = vmul.f32 %v2194_v61, %v1485_v23 }
 0xb3a   : > { %v1496_v63 = vsub.f32 1.0, %v1494_v62 }
 0xb3b   : > { %v1497_v46 = vsub.f32 1.0, %v1495_v55 }
 0xb3c   : > { %v1498_v6 = vmul.f32 %v1496_v63, %v1456_v3 }
 0xb3d   : > { %v1499_v28 = vmul.f32 %v1497_v46, %v1457_v57 }
 0xb3e   : > { %v1500_v60 = vadd.f32 1.0, %v1498_v6 }
 0xb3f   : > { %v1501_v8 = vadd.f32 1.0, %v1499_v28 }
 0xb40   : > { %v1502_v9 = vmul.f32 %v1500_v60, %v1450_v7 }
 0xb41   : > { %v1503_v10 = vmul.f32 %v1501_v8, %v1451_v52 }
 0xb42   : > { %1512 = vrot.lane.b32.xlu1 %v1502_v9, %s2211_s16 }
 0xb43   : > { %1514 = vrot.lane.b32.xlu0 %v1503_v10, %s2211_s16  ;;  %s1775_s16 = sshll.u32 %s2660_s19, 3 }
 0xbb4   : > { %v1513_v11 = vpop.permute.xlu1 %1512 }
 0xbb5   : > { %1519 = vst.msk [vmem:[#allocation4] sm:$0xff] %vm1518_vm5, %v1513_v11  ;;  %v1515_v13 = vpop.permute.xlu0 %1514 }
 0xbb6   : > { %1520 = vst.msk [vmem:[#allocation4 + $0x8] sm:$0xff] %vm1504_vm1, %v1513_v11  ;;  %1522 = vst.msk [vmem:[#allocation4 + $0x18] sm:$0xff] %vm1504_vm1, %v1515_v13 }
 0xbb7   : > { %1521 = vst.msk [vmem:[#allocation4 + $0x10] sm:$0xff] %vm1518_vm5, %v1515_v13 }
 0xbbc   : > { %v1523_v27 = vld [vmem:[#allocation4] sm:$0xff] }
 0xbbd   : > { %v1525_v54 = vld [vmem:[#allocation4 + $0x8] sm:$0xff]  ;;  %v1526_v18 = vld [vmem:[#allocation4 + $0x18] sm:$0xff] }
 0xbbe   : > { %v2096_v15 = vpack.i.bf16 %v1525_v54, %v1523_v27  ;;  %v1524_v16 = vld [vmem:[#allocation4 + $0x10] sm:$0xff] }
 0xbbf   : > { %v2061_v20 = vpack.i.bf16 %v1526_v18, %v1524_v16  ;;  %v1980_v0 = vpack.c.bf16 %v1524_v16, %v1523_v27 }
 0xbc0   : > { %2097 = vrot.lane.b32.xlu1 %v2096_v15, %s2208_s28 }
 0xbc1   : > { %2062 = vrot.lane.b32.xlu0 %v2061_v20, %s2208_s28  ;;  %1981 = vmatpush1.bf16.msra.mxu1 %v1980_v0 }
 0xbc2   : > { %1982 = vmatprep.subr.bf16.mxu1 %v2207_v47 }
 0xbc4   : > { %2102 = vrot.lane.b32.xlu1 %v2096_v15, %s2209_s29 }
 0xbc5   : > { %2067 = vrot.lane.b32.xlu0 %v2061_v20, %s2209_s29  ;;  %s2217_s29 = smov 120  }
 0xbc8   : > { %2107 = vrot.lane.b32.xlu1 %v2096_v15, %s2212_s17 }
 0xbc9   : > { %2072 = vrot.lane.b32.xlu0 %v2061_v20, %s2212_s17 }
 0xbcc   : > { %2112 = vrot.lane.b32.xlu1 %v2096_v15, %s2213_s20 }
 0xbcd   : > { %2077 = vrot.lane.b32.xlu0 %v2061_v20, %s2213_s20 }
 0xbd0   : > { %2117 = vrot.lane.b32.xlu1 %v2096_v15, %s2214_s27 }
 0xbd1   : > { %2082 = vrot.lane.b32.xlu0 %v2061_v20, %s2214_s27  ;;  %s492_s27 = scalar_lea.vmem %s2658_s15, %s1775_s16 }
 0xbd4   : > { %2122 = vrot.lane.b32.xlu1 %v2096_v15, %s2215_s21 }
 0xbd5   : > { %2087 = vrot.lane.b32.xlu0 %v2061_v20, %s2215_s21 }
 0xbd8   : > { %2127 = vrot.lane.b32.xlu1 %v2096_v15, %s2216_s23 }
 0xbd9   : > { %2092 = vrot.lane.b32.xlu0 %v2061_v20, %s2216_s23 }
 0xbdc   : > { %2132 = vrot.lane.b32.xlu1 %v2096_v15, %s2217_s29 }
 0xbdd   : > { %2137 = vrot.lane.b32.xlu0 %v2061_v20, %s2217_s29 }
 0xbe0   : > { %1637 = vperm.xlu1 %2030, %v1398_v22  }
 0xc32   : > { %v2098_v2 = vpop.permute.xlu1 %2097 }
 0xc33   : > { %v2100_v24 = vunpack.i.h.bf16 %v2098_v2  ;;  %v2099_v26 = vunpack.i.l.bf16 %v2098_v2  ;;  %v2063_v29 = vpop.permute.xlu0 %2062 }
 0xc34   : > { %v2065_v1 = vunpack.i.h.bf16 %v2063_v29  ;;  %v2064_v31 = vunpack.i.l.bf16 %v2063_v29 }
 0xc35   : > { %v1540_v32 = vsel %vm1539_vm7, %v2099_v26, %v2100_v24 }
 0xc36   : > { %v1541_v5 = vsel %vm1539_vm7, %v2064_v31, %v2065_v1  ;;  %v2103_v33 = vpop.permute.xlu1 %2102 }
 0xc37   : > { %v1983_v34 = vpack.c.bf16 %v1541_v5, %v1540_v32  ;;  %v2105_v14 = vunpack.i.h.bf16 %v2103_v33  ;;  %v2104_v4 = vunpack.i.l.bf16 %v2103_v33  ;;  %v2068_v35 = vpop.permute.xlu0 %2067 }
 0xc38   : > { %v2070_v36 = vunpack.i.h.bf16 %v2068_v35  ;;  %v2069_v37 = vunpack.i.l.bf16 %v2068_v35 }
 0xc39   : > { %v1553_v38 = vsel %vm1552_vm8, %v2104_v4, %v2105_v14  ;;  %1984 = vmatpush1.bf16.msra.mxu1 %v1983_v34  ;;  %v1396_v34 = vld [vmem:[%s2656_s13] sm:$0x1f] }
 0xc3a   : > { %v1554_v39 = vsel %vm1552_vm8, %v2069_v37, %v2070_v36  ;;  %v2108_v40 = vpop.permute.xlu1 %2107  ;;  %1985 = vmatprep.subr.bf16.mxu1 %v2207_v47 }
 0xc3b   : > { %v1986_v41 = vpack.c.bf16 %v1554_v39, %v1553_v38  ;;  %v2110_v42 = vunpack.i.h.bf16 %v2108_v40  ;;  %v2109_v43 = vunpack.i.l.bf16 %v2108_v40  ;;  %v2073_v44 = vpop.permute.xlu0 %2072 }
 0xc3c   : > { %v2075_v19 = vunpack.i.h.bf16 %v2073_v44  ;;  %v2074_v45 = vunpack.i.l.bf16 %v2073_v44 }
 0xc3d   : > { %v1566_v12 = vsel %vm1565_vm9, %v2109_v43, %v2110_v42  ;;  %1987 = vmatpush1.bf16.msra.mxu1 %v1986_v41 }
 0xc3e   : > { %v1567_v48 = vsel %vm1565_vm9, %v2074_v45, %v2075_v19  ;;  %v2113_v50 = vpop.permute.xlu1 %2112  ;;  %1988 = vmatprep.subr.bf16.mxu1 %v2207_v47 }
 0xc3f   : > { %v1989_v25 = vpack.c.bf16 %v1567_v48, %v1566_v12  ;;  %v2115_v51 = vunpack.i.h.bf16 %v2113_v50  ;;  %v2114_v53 = vunpack.i.l.bf16 %v2113_v50  ;;  %v2078_v17 = vpop.permute.xlu0 %2077 }
 0xc40   : > { %v2080_v56 = vunpack.i.h.bf16 %v2078_v17  ;;  %v2079_v49 = vunpack.i.l.bf16 %v2078_v17 }
 0xc41   : > { %v1579_v58 = vsel %vm1578_vm10, %v2114_v53, %v2115_v51  ;;  %1990 = vmatpush1.bf16.msra.mxu1 %v1989_v25 }
 0xc42   : > { %v1580_v59 = vsel %vm1578_vm10, %v2079_v49, %v2080_v56  ;;  %v2118_v30 = vpop.permute.xlu1 %2117  ;;  %1991 = vmatprep.subr.bf16.mxu1 %v2207_v47 }
 0xc43   : > { %v1992_v23 = vpack.c.bf16 %v1580_v59, %v1579_v58  ;;  %v2120_v61 = vunpack.i.h.bf16 %v2118_v30  ;;  %v2119_v62 = vunpack.i.l.bf16 %v2118_v30  ;;  %v2083_v55 = vpop.permute.xlu0 %2082 }
 0xc44   : > { %v2085_v63 = vunpack.i.h.bf16 %v2083_v55  ;;  %v2084_v3 = vunpack.i.l.bf16 %v2083_v55 }
 0xc45   : > { %v1592_v46 = vsel %vm1591_vm11, %v2119_v62, %v2120_v61  ;;  %1993 = vmatpush1.bf16.msra.mxu1 %v1992_v23 }
 0xc46   : > { %v1593_v57 = vsel %vm1591_vm11, %v2084_v3, %v2085_v63  ;;  %v2123_v6 = vpop.permute.xlu1 %2122  ;;  %1994 = vmatprep.subr.bf16.mxu1 %v2207_v47 }
 0xc47   : > { %v1995_v28 = vpack.c.bf16 %v1593_v57, %v1592_v46  ;;  %v2125_v7 = vunpack.i.h.bf16 %v2123_v6  ;;  %v2124_v60 = vunpack.i.l.bf16 %v2123_v6  ;;  %v2088_v52 = vpop.permute.xlu0 %2087 }
 0xc48   : > { %v2090_v8 = vunpack.i.h.bf16 %v2088_v52  ;;  %v2089_v9 = vunpack.i.l.bf16 %v2088_v52 }
 0xc49   : > { %v1605_v10 = vsel %vm1604_vm12, %v2124_v60, %v2125_v7  ;;  %1996 = vmatpush1.bf16.msra.mxu1 %v1995_v28 }
 0xc4a   : > { %v1606_v11 = vsel %vm1604_vm12, %v2089_v9, %v2090_v8  ;;  %v2128_v13 = vpop.permute.xlu1 %2127  ;;  %1997 = vmatprep.subr.bf16.mxu1 %v2207_v47 }
 0xc4b   : > { %v1998_v27 = vpack.c.bf16 %v1606_v11, %v1605_v10  ;;  %v2130_v54 = vunpack.i.h.bf16 %v2128_v13  ;;  %v2129_v15 = vunpack.i.l.bf16 %v2128_v13  ;;  %v2093_v16 = vpop.permute.xlu0 %2092 }
 0xc4c   : > { %v2095_v18 = vunpack.i.h.bf16 %v2093_v16  ;;  %v2094_v20 = vunpack.i.l.bf16 %v2093_v16 }
 0xc4d   : > { %v1618_v0 = vsel %vm1617_vm13, %v2129_v15, %v2130_v54  ;;  %1999 = vmatpush1.bf16.msra.mxu1 %v1998_v27 }
 0xc4e   : > { %v1619_v21 = vsel %vm1617_vm13, %v2094_v20, %v2095_v18  ;;  %v2133_v22 = vpop.permute.xlu1 %2132  ;;  %2000 = vmatprep.subr.bf16.mxu1 %v2207_v47 }
 0xc4f   : > { %v2001_v2 = vpack.c.bf16 %v1619_v21, %v1618_v0  ;;  %v2135_v24 = vunpack.i.h.bf16 %v2133_v22  ;;  %v2134_v26 = vunpack.i.l.bf16 %v2133_v22  ;;  %v2138_v29 = vpop.permute.xlu0 %2137 }
 0xc50   : > { %v2140_v1 = vunpack.i.h.bf16 %v2138_v29  ;;  %v2139_v31 = vunpack.i.l.bf16 %v2138_v29 }
 0xc51   : > { %v1631_v32 = vsel %vm1630_vm14, %v2134_v26, %v2135_v24  ;;  %2002 = vmatpush1.bf16.msra.mxu1 %v2001_v2 }
 0xc52   : > { %v1632_v5 = vsel %vm1630_vm14, %v2139_v31, %v2140_v1  ;;  %2003 = vmatprep.subr.bf16.mxu1 %v2207_v47 }
 0xc53   : > { %v2004_v33 = vpack.c.bf16 %v1632_v5, %v1631_v32 }
 0xc55   : > { %2005 = vmatpush1.bf16.msra.mxu1 %v2004_v33 }
 0xc58   : > { %1709 = vmatmul.mubr.f32.vlgmr.msra.gmra.mrb[2].mxu1 %v1396_v34 }
 0xc5f   : > { %v1638_v14 = vpop.permute.xlu1 %1637 }
 0xd2b   : > { %v1710_v4 = vpop.f32.mrb[2].mxu1 }
 0xd2c   : > { %v1711_v35 = vadd.f32 %v1710_v4, %v1638_v14  ;;  %v1712_v36 = vpop.f32.mrb[3].mxu1 }
 0xd2e   : > { %1714 = vst [vmem:[%s492_s27] sm:$0x1f] %v1711_v35 }
 0xd2f PF: > { %s25_s18 = sadd.s32 1, %s2201_s18  }
 0xd30   : > { %p22_p4 = scmp.ge.s32.totalorder %s25_s18, 4  }
 0xd32   :  { %24 = sbr.rel (!%p22_p4) target bundleno = 1 (0x1), region = 110 }

</bundles_post_ra>
